<compile_context>
chip_gen: v6e
topology: v6e:2x2x1
jax: 0.10.0
libtpu: 0.0.40
codegen_flags: <defaults>
</compile_context>

<pallas_src>
import functools

import jax
import jax.numpy as jnp
from jax import lax
from jax.experimental import pallas as pl
from jax.experimental.pallas import tpu as pltpu

EPS = 1e-5  # nn.InstanceNorm2d default eps


def _resblock_se_kernel(x_ref, wf1_ref, b1_ref, wf2_ref, b2_ref,
                        sew1t_ref, sew2_ref, o_ref, *, H, W):
    # x_ref:    (1, C, H*W) f32   lane-dense input slab (NCHW flattened spatial)
    # wf*_ref:  (C, 9*C)          fused conv weights, column index = (dy*3+dx)*C + ci
    # b*_ref:   (C, 1)            conv bias
    # sew1t_ref:(C, hidden)       SE fc1 weight transposed; sew2_ref: (C, hidden)
    # o_ref:    (1, C, H*W)
    HW = H * W
    x = x_ref[0]                                            # (C, HW)

    # Validity masks along the flattened-spatial lane axis (loop-invariant, tiny).
    col = lax.broadcasted_iota(jnp.int32, (1, HW), 1)       # (1, HW)
    j = col % W
    m_left = (j != 0).astype(jnp.float32)                   # tap dx=0 needs column j-1
    m_right = (j != W - 1).astype(jnp.float32)              # tap dx=2 needs column j+1
    m_top = (col >= W).astype(jnp.float32)                  # tap dy=0 needs row y-1
    m_bot = (col < HW - W).astype(jnp.float32)              # tap dy=2 needs row y+1

    def im2col(a):
        # a: (C, HW). Returns (9C, HW); sublane block (dy*3+dx)*C..+C holds a shifted
        # so lane p carries a[:, y+dy-1, j+dx-1] (zero outside the image).
        # pltpu.roll = circular shift toward higher lane indices (XLU); masks kill wrap.
        left = pltpu.roll(a, 1, 1) * m_left                 # dx=0
        right = pltpu.roll(a, HW - 1, 1) * m_right          # dx=2
        row3 = jnp.concatenate([left, a, right], axis=0)    # (3C, HW), dy=1
        up = pltpu.roll(row3, W, 1) * m_top                 # dy=0
        down = pltpu.roll(row3, HW - W, 1) * m_bot          # dy=2
        return jnp.concatenate([up, row3, down], axis=0)    # (9C, HW)

    def conv3x3(a, wf_ref, b_ref):
        # One fat MXU contraction per conv: (C, 9C) x (9C, HW).
        patches = im2col(a).astype(wf_ref.dtype)            # cast only at MXU boundary
        acc = jnp.dot(wf_ref[...], patches, preferred_element_type=jnp.float32)
        return acc + b_ref[...]                             # (C, HW) + (C, 1)

    def instance_norm(h):
        # per-sample, per-channel over spatial (biased variance), no affine (f32)
        mean = jnp.mean(h, axis=1, keepdims=True)           # (C, 1)
        var = jnp.mean((h - mean) ** 2, axis=1, keepdims=True)
        return (h - mean) * lax.rsqrt(var + EPS)

    # Conv2dBlock #1: conv -> IN -> ReLU
    h1 = jnp.maximum(instance_norm(conv3x3(x, wf1_ref, b1_ref)), 0.0)
    # Conv2dBlock #2: conv -> IN (no activation)
    h2 = instance_norm(conv3x3(h1, wf2_ref, b2_ref))

    # SE block on the VPU/XLU (no 1-row MXU matmuls): pool -> fc -> relu -> fc -> sigmoid
    y = jnp.mean(h2, axis=1, keepdims=True)                                    # (C, 1)
    hid = jnp.maximum(jnp.sum(sew1t_ref[...] * y, axis=0, keepdims=True), 0.0)  # (1, hid)
    s = jax.nn.sigmoid(jnp.sum(sew2_ref[...] * hid, axis=1, keepdims=True))     # (C, 1)

    # scale + residual + lane-dense store (last dim = H*W, multiple of 128)
    o_ref[0] = h2 * s + x


def _prep_conv_weight(w, dtype):
    # PyTorch OIHW (Cout, Cin, 3, 3) -> (Cout, 9*Cin), column = (dy*3+dx)*Cin + ci
    c_out, c_in = w.shape[0], w.shape[1]
    return jnp.transpose(w, (0, 2, 3, 1)).reshape(c_out, 9 * c_in).astype(dtype)


def resblock_with_se(x_nchw, w1, b1, w2, b2, se_w1, se_w2,
                     *, matmul_dtype=jnp.float32):
    """x_nchw: (B, C, H, W) f32; conv weights PyTorch OIHW; SE weights PyTorch (out, in).

    matmul_dtype=jnp.bfloat16 enables the fast MXU path on v6e/v7x (f32 accumulation,
    f32 InstanceNorm / elementwise)."""
    B, C, H, W = x_nchw.shape
    hidden = se_w1.shape[0]
    HW = H * W

    # Glue (all free XLA reshapes/transposes -- no data-layout work in the kernel).
    x = x_nchw.reshape(B, C, HW).astype(jnp.float32)
    wf1 = _prep_conv_weight(w1, matmul_dtype)
    wf2 = _prep_conv_weight(w2, matmul_dtype)
    b1c = b1.reshape(C, 1).astype(jnp.float32)
    b2c = b2.reshape(C, 1).astype(jnp.float32)
    sew1t = se_w1.T.astype(jnp.float32)        # (C, hidden)
    sew2c = se_w2.astype(jnp.float32)          # (C, hidden)

    kernel = functools.partial(_resblock_se_kernel, H=H, W=W)

    out = pl.pallas_call(
        kernel,
        out_shape=jax.ShapeDtypeStruct((B, C, HW), jnp.float32),
        grid_spec=pltpu.PrefetchScalarGridSpec(
            num_scalar_prefetch=0,
            grid=(B,),
            in_specs=[
                pl.BlockSpec((1, C, HW), lambda b: (b, 0, 0)),
                pl.BlockSpec((C, 9 * C), lambda b: (0, 0)),
                pl.BlockSpec((C, 1), lambda b: (0, 0)),
                pl.BlockSpec((C, 9 * C), lambda b: (0, 0)),
                pl.BlockSpec((C, 1), lambda b: (0, 0)),
                pl.BlockSpec((C, hidden), lambda b: (0, 0)),
                pl.BlockSpec((C, hidden), lambda b: (0, 0)),
            ],
            out_specs=pl.BlockSpec((1, C, HW), lambda b: (b, 0, 0)),
        ),
        compiler_params=pltpu.CompilerParams(
            dimension_semantics=("parallel",),          # batch elems independent (v7x 2-TC)
            vmem_limit_bytes=32 * 1024 * 1024,
        ),
    )(x, wf1, b1c, wf2, b2c, sew1t, sew2c)

    return out.reshape(B, C, H, W)


def reference_resblock(x, w1, b1, w2, b2, se_w1, se_w2):
    # pure-JAX reference mirroring the PyTorch ResBlockWithSE forward
    def conv(x, w, b):
        y = lax.conv_general_dilated(x, w, (1, 1), ((1, 1), (1, 1)),
                                     dimension_numbers=('NCHW', 'OIHW', 'NCHW'))
        return y + b[None, :, None, None]

    def inorm(x):
        mean = x.mean(axis=(2, 3), keepdims=True)
        var = ((x - mean) ** 2).mean(axis=(2, 3), keepdims=True)
        return (x - mean) * lax.rsqrt(var + EPS)

    h = jnp.maximum(inorm(conv(x, w1, b1)), 0.0)
    h = inorm(conv(h, w2, b2))
    y = h.mean(axis=(2, 3))                        # (B, C)
    hid = jnp.maximum(y @ se_w1.T, 0.0)
    s = jax.nn.sigmoid(hid @ se_w2.T)              # (B, C)
    return h * s[:, :, None, None] + x


if __name__ == "__main__":
    B, C, H, W = 2, 32, 16, 16     # dim=32 -> SE hidden = 32 // 16 = 2
    hidden = C // 16

    key = jax.random.PRNGKey(0)
    kx, kparams = jax.random.split(key)
    x = jax.random.normal(kx, (B, C, H, W), jnp.float32)

    def make_params(k):
        kk = jax.random.split(k, 6)
        w1 = jax.random.normal(kk[0], (C, C, 3, 3), jnp.float32) * 0.05
        b1 = jax.random.normal(kk[1], (C,), jnp.float32) * 0.05
        w2 = jax.random.normal(kk[2], (C, C, 3, 3), jnp.float32) * 0.05
        b2 = jax.random.normal(kk[3], (C,), jnp.float32) * 0.05
        se_w1 = jax.random.normal(kk[4], (hidden, C), jnp.float32) * 0.1
        se_w2 = jax.random.normal(kk[5], (C, hidden), jnp.float32) * 0.1
        return (w1, b1, w2, b2, se_w1, se_w2)

    params = [make_params(k) for k in jax.random.split(kparams, 2)]

    # Single block, f32 MXU path.
    out1 = jax.block_until_ready(resblock_with_se(x, *params[0]))
    ref1 = jax.block_until_ready(reference_resblock(x, *params[0]))
    assert out1.shape == (B, C, H, W)
    assert jnp.allclose(out1, ref1, atol=3e-3, rtol=3e-3), \
        float(jnp.max(jnp.abs(out1 - ref1)))

    # ContentEncoder residual stage: n_res=2 ResBlockWithSE blocks applied sequentially.
    out = x
    ref = x
    for p in params:
        out = resblock_with_se(out, *p)
        ref = reference_resblock(ref, *p)
    out = jax.block_until_ready(out)
    ref = jax.block_until_ready(ref)
    assert jnp.allclose(out, ref, atol=1e-2, rtol=1e-2), \
        float(jnp.max(jnp.abs(out - ref)))

    # bf16 MXU fast path (v6e/v7x): loose check for the reduced-precision matmuls.
    out_bf16 = jax.block_until_ready(
        resblock_with_se(x, *params[0], matmul_dtype=jnp.bfloat16))
    assert jnp.allclose(out_bf16, ref1, atol=1e-1, rtol=1e-1), \
        float(jnp.max(jnp.abs(out_bf16 - ref1)))

    print("KERNEL_OK")
</pallas_src>

<mosaic_0001>
module attributes {stable_mosaic.version = 11 : i64} {
  func.func @_resblock_se_kernel(%arg0: i32, %arg1: memref<1x32x256xf32, #tpu.memory_space<vmem>>, %arg2: memref<32x288xf32, #tpu.memory_space<vmem>>, %arg3: memref<32x1xf32, #tpu.memory_space<vmem>>, %arg4: memref<32x288xf32, #tpu.memory_space<vmem>>, %arg5: memref<32x1xf32, #tpu.memory_space<vmem>>, %arg6: memref<32x2xf32, #tpu.memory_space<vmem>>, %arg7: memref<32x2xf32, #tpu.memory_space<vmem>>, %arg8: memref<1x32x256xf32, #tpu.memory_space<vmem>>) attributes {dimension_semantics = [#tpu.dimension_semantics<parallel>], iteration_bounds = array<i64: 2>, scalar_prefetch = 0 : i64, scratch_operands = 0 : i64, tpu.core_type = #tpu.core_type<tc>, window_params = [{transform_indices = @transform_0, window_bounds = array<i64: 1, 32, 256>}, {pipeline_mode = #tpu.pipeline_mode<synchronous>, transform_indices = @transform_1, window_bounds = array<i64: 32, 288>}, {pipeline_mode = #tpu.pipeline_mode<synchronous>, transform_indices = @transform_2, window_bounds = array<i64: 32, 1>}, {pipeline_mode = #tpu.pipeline_mode<synchronous>, transform_indices = @transform_3, window_bounds = array<i64: 32, 288>}, {pipeline_mode = #tpu.pipeline_mode<synchronous>, transform_indices = @transform_4, window_bounds = array<i64: 32, 1>}, {pipeline_mode = #tpu.pipeline_mode<synchronous>, transform_indices = @transform_5, window_bounds = array<i64: 32, 2>}, {pipeline_mode = #tpu.pipeline_mode<synchronous>, transform_indices = @transform_6, window_bounds = array<i64: 32, 2>}, {transform_indices = @transform_7, window_bounds = array<i64: 1, 32, 256>}]} {
    %c0 = arith.constant 0 : index
    %c0_0 = arith.constant 0 : index
    %c0_1 = arith.constant 0 : index
    %0 = vector.load %arg1[%c0, %c0_0, %c0_1] : memref<1x32x256xf32, #tpu.memory_space<vmem>>, vector<1x32x256xf32>
    %1 = vector.shape_cast %0 : vector<1x32x256xf32> to vector<32x256xf32>
    %2 = tpu.iota {dimensions = array<i32: 1>} : vector<1x256xi32>
    %c16_i32 = arith.constant 16 : i32
    %c0_i32 = arith.constant 0 : i32
    %3 = arith.cmpi eq, %c16_i32, %c0_i32 : i32
    %c1_i32 = arith.constant 1 : i32
    %4 = arith.select %3, %c1_i32, %c16_i32 : i32
    %5 = vector.broadcast %4 : i32 to vector<1x256xi32>
    %6 = arith.remsi %2, %5 : vector<1x256xi32>
    %c0_i32_2 = arith.constant 0 : i32
    %7 = vector.broadcast %c0_i32_2 : i32 to vector<1x256xi32>
    %8 = arith.cmpi ne, %6, %7 : vector<1x256xi32>
    %c0_i32_3 = arith.constant 0 : i32
    %9 = vector.broadcast %c0_i32_3 : i32 to vector<1x256xi32>
    %10 = arith.cmpi slt, %6, %9 : vector<1x256xi32>
    %c0_i32_4 = arith.constant 0 : i32
    %11 = arith.cmpi slt, %4, %c0_i32_4 : i32
    %12 = vector.broadcast %11 : i1 to vector<1x256xi1>
    %13 = vector.broadcast %12 : vector<1x256xi1> to vector<1x256xi1>
    %14 = arith.xori %10, %13 : vector<1x256xi1>
    %15 = arith.andi %14, %8 : vector<1x256xi1>
    %16 = vector.broadcast %4 : i32 to vector<1x256xi32>
    %17 = arith.addi %6, %16 : vector<1x256xi32>
    %18 = arith.select %15, %17, %6 : vector<1x256xi1>, vector<1x256xi32>
    %c0_i32_5 = arith.constant 0 : i32
    %19 = vector.broadcast %c0_i32_5 : i32 to vector<1x256xi32>
    %20 = arith.cmpi ne, %18, %19 : vector<1x256xi32>
    %21 = arith.extui %20 : vector<1x256xi1> to vector<1x256xi32>
    %22 = arith.sitofp %21 : vector<1x256xi32> to vector<1x256xf32>
    %c15_i32 = arith.constant 15 : i32
    %23 = vector.broadcast %c15_i32 : i32 to vector<1x256xi32>
    %24 = arith.cmpi ne, %18, %23 : vector<1x256xi32>
    %25 = arith.extui %24 : vector<1x256xi1> to vector<1x256xi32>
    %26 = arith.sitofp %25 : vector<1x256xi32> to vector<1x256xf32>
    %c16_i32_6 = arith.constant 16 : i32
    %27 = vector.broadcast %c16_i32_6 : i32 to vector<1x256xi32>
    %28 = arith.cmpi sge, %2, %27 : vector<1x256xi32>
    %29 = arith.extui %28 : vector<1x256xi1> to vector<1x256xi32>
    %30 = arith.sitofp %29 : vector<1x256xi32> to vector<1x256xf32>
    %c240_i32 = arith.constant 240 : i32
    %31 = vector.broadcast %c240_i32 : i32 to vector<1x256xi32>
    %32 = arith.cmpi slt, %2, %31 : vector<1x256xi32>
    %33 = arith.extui %32 : vector<1x256xi1> to vector<1x256xi32>
    %34 = arith.sitofp %33 : vector<1x256xi32> to vector<1x256xf32>
    %c1_i32_7 = arith.constant 1 : i32
    %35 = tpu.dynamic_rotate %1 by %c1_i32_7 dim 1 : vector<32x256xf32>, i32 -> vector<32x256xf32>
    %36 = vector.broadcast %22 : vector<1x256xf32> to vector<32x256xf32>
    %37 = arith.mulf %35, %36 : vector<32x256xf32>
    %c255_i32 = arith.constant 255 : i32
    %38 = tpu.dynamic_rotate %1 by %c255_i32 dim 1 : vector<32x256xf32>, i32 -> vector<32x256xf32>
    %39 = vector.broadcast %26 : vector<1x256xf32> to vector<32x256xf32>
    %40 = arith.mulf %38, %39 : vector<32x256xf32>
    %41 = tpu.concatenate %37, %1, %40 in 0 : vector<32x256xf32>, vector<32x256xf32>, vector<32x256xf32> -> vector<96x256xf32>
    %c16_i32_8 = arith.constant 16 : i32
    %42 = tpu.dynamic_rotate %41 by %c16_i32_8 dim 1 : vector<96x256xf32>, i32 -> vector<96x256xf32>
    %43 = vector.broadcast %30 : vector<1x256xf32> to vector<96x256xf32>
    %44 = arith.mulf %42, %43 : vector<96x256xf32>
    %c240_i32_9 = arith.constant 240 : i32
    %45 = tpu.dynamic_rotate %41 by %c240_i32_9 dim 1 : vector<96x256xf32>, i32 -> vector<96x256xf32>
    %46 = vector.broadcast %34 : vector<1x256xf32> to vector<96x256xf32>
    %47 = arith.mulf %45, %46 : vector<96x256xf32>
    %48 = tpu.concatenate %44, %41, %47 in 0 : vector<96x256xf32>, vector<96x256xf32>, vector<96x256xf32> -> vector<288x256xf32>
    %c0_10 = arith.constant 0 : index
    %c0_11 = arith.constant 0 : index
    %49 = vector.load %arg2[%c0_10, %c0_11] : memref<32x288xf32, #tpu.memory_space<vmem>>, vector<32x288xf32>
    %cst = arith.constant dense<0.000000e+00> : vector<32x256xf32>
    %50 = tpu.matmul %49, %48, %cst {dimension_numbers = #tpu.dot_dimension_numbers<[1], [0], [0], [1], [0, 0, 1, 1], [], []>} : vector<32x288xf32>, vector<288x256xf32>, vector<32x256xf32> -> vector<32x256xf32>
    %c0_12 = arith.constant 0 : index
    %c0_13 = arith.constant 0 : index
    %51 = vector.load %arg3[%c0_12, %c0_13] : memref<32x1xf32, #tpu.memory_space<vmem>>, vector<32x1xf32>
    %52 = vector.broadcast %51 : vector<32x1xf32> to vector<32x256xf32>
    %53 = arith.addf %50, %52 : vector<32x256xf32>
    %cst_14 = arith.constant dense<0.000000e+00> : vector<32xf32>
    %54 = vector.multi_reduction <add>, %53, %cst_14 [1] : vector<32x256xf32> to vector<32xf32>
    %55 = vector.shape_cast %54 : vector<32xf32> to vector<32x1xf32>
    %cst_15 = arith.constant 2.560000e+02 : f32
    %56 = vector.broadcast %cst_15 : f32 to vector<32x1xf32>
    %57 = arith.divf %55, %56 : vector<32x1xf32>
    %58 = vector.broadcast %57 : vector<32x1xf32> to vector<32x256xf32>
    %59 = arith.subf %53, %58 : vector<32x256xf32>
    %60 = arith.mulf %59, %59 : vector<32x256xf32>
    %cst_16 = arith.constant dense<0.000000e+00> : vector<32xf32>
    %61 = vector.multi_reduction <add>, %60, %cst_16 [1] : vector<32x256xf32> to vector<32xf32>
    %62 = vector.shape_cast %61 : vector<32xf32> to vector<32x1xf32>
    %cst_17 = arith.constant 2.560000e+02 : f32
    %63 = vector.broadcast %cst_17 : f32 to vector<32x1xf32>
    %64 = arith.divf %62, %63 : vector<32x1xf32>
    %65 = vector.broadcast %57 : vector<32x1xf32> to vector<32x256xf32>
    %66 = arith.subf %53, %65 : vector<32x256xf32>
    %cst_18 = arith.constant 9.99999974E-6 : f32
    %67 = vector.broadcast %cst_18 : f32 to vector<32x1xf32>
    %68 = arith.addf %64, %67 : vector<32x1xf32>
    %69 = math.rsqrt %68 : vector<32x1xf32>
    %70 = vector.broadcast %69 : vector<32x1xf32> to vector<32x256xf32>
    %71 = arith.mulf %66, %70 : vector<32x256xf32>
    %cst_19 = arith.constant 0.000000e+00 : f32
    %72 = vector.broadcast %cst_19 : f32 to vector<32x256xf32>
    %73 = arith.maximumf %71, %72 : vector<32x256xf32>
    %c1_i32_20 = arith.constant 1 : i32
    %74 = tpu.dynamic_rotate %73 by %c1_i32_20 dim 1 : vector<32x256xf32>, i32 -> vector<32x256xf32>
    %75 = vector.broadcast %22 : vector<1x256xf32> to vector<32x256xf32>
    %76 = arith.mulf %74, %75 : vector<32x256xf32>
    %c255_i32_21 = arith.constant 255 : i32
    %77 = tpu.dynamic_rotate %73 by %c255_i32_21 dim 1 : vector<32x256xf32>, i32 -> vector<32x256xf32>
    %78 = vector.broadcast %26 : vector<1x256xf32> to vector<32x256xf32>
    %79 = arith.mulf %77, %78 : vector<32x256xf32>
    %80 = tpu.concatenate %76, %73, %79 in 0 : vector<32x256xf32>, vector<32x256xf32>, vector<32x256xf32> -> vector<96x256xf32>
    %c16_i32_22 = arith.constant 16 : i32
    %81 = tpu.dynamic_rotate %80 by %c16_i32_22 dim 1 : vector<96x256xf32>, i32 -> vector<96x256xf32>
    %82 = vector.broadcast %30 : vector<1x256xf32> to vector<96x256xf32>
    %83 = arith.mulf %81, %82 : vector<96x256xf32>
    %c240_i32_23 = arith.constant 240 : i32
    %84 = tpu.dynamic_rotate %80 by %c240_i32_23 dim 1 : vector<96x256xf32>, i32 -> vector<96x256xf32>
    %85 = vector.broadcast %34 : vector<1x256xf32> to vector<96x256xf32>
    %86 = arith.mulf %84, %85 : vector<96x256xf32>
    %87 = tpu.concatenate %83, %80, %86 in 0 : vector<96x256xf32>, vector<96x256xf32>, vector<96x256xf32> -> vector<288x256xf32>
    %c0_24 = arith.constant 0 : index
    %c0_25 = arith.constant 0 : index
    %88 = vector.load %arg4[%c0_24, %c0_25] : memref<32x288xf32, #tpu.memory_space<vmem>>, vector<32x288xf32>
    %cst_26 = arith.constant dense<0.000000e+00> : vector<32x256xf32>
    %89 = tpu.matmul %88, %87, %cst_26 {dimension_numbers = #tpu.dot_dimension_numbers<[1], [0], [0], [1], [0, 0, 1, 1], [], []>} : vector<32x288xf32>, vector<288x256xf32>, vector<32x256xf32> -> vector<32x256xf32>
    %c0_27 = arith.constant 0 : index
    %c0_28 = arith.constant 0 : index
    %90 = vector.load %arg5[%c0_27, %c0_28] : memref<32x1xf32, #tpu.memory_space<vmem>>, vector<32x1xf32>
    %91 = vector.broadcast %90 : vector<32x1xf32> to vector<32x256xf32>
    %92 = arith.addf %89, %91 : vector<32x256xf32>
    %cst_29 = arith.constant dense<0.000000e+00> : vector<32xf32>
    %93 = vector.multi_reduction <add>, %92, %cst_29 [1] : vector<32x256xf32> to vector<32xf32>
    %94 = vector.shape_cast %93 : vector<32xf32> to vector<32x1xf32>
    %cst_30 = arith.constant 2.560000e+02 : f32
    %95 = vector.broadcast %cst_30 : f32 to vector<32x1xf32>
    %96 = arith.divf %94, %95 : vector<32x1xf32>
    %97 = vector.broadcast %96 : vector<32x1xf32> to vector<32x256xf32>
    %98 = arith.subf %92, %97 : vector<32x256xf32>
    %99 = arith.mulf %98, %98 : vector<32x256xf32>
    %cst_31 = arith.constant dense<0.000000e+00> : vector<32xf32>
    %100 = vector.multi_reduction <add>, %99, %cst_31 [1] : vector<32x256xf32> to vector<32xf32>
    %101 = vector.shape_cast %100 : vector<32xf32> to vector<32x1xf32>
    %cst_32 = arith.constant 2.560000e+02 : f32
    %102 = vector.broadcast %cst_32 : f32 to vector<32x1xf32>
    %103 = arith.divf %101, %102 : vector<32x1xf32>
    %104 = vector.broadcast %96 : vector<32x1xf32> to vector<32x256xf32>
    %105 = arith.subf %92, %104 : vector<32x256xf32>
    %cst_33 = arith.constant 9.99999974E-6 : f32
    %106 = vector.broadcast %cst_33 : f32 to vector<32x1xf32>
    %107 = arith.addf %103, %106 : vector<32x1xf32>
    %108 = math.rsqrt %107 : vector<32x1xf32>
    %109 = vector.broadcast %108 : vector<32x1xf32> to vector<32x256xf32>
    %110 = arith.mulf %105, %109 : vector<32x256xf32>
    %cst_34 = arith.constant dense<0.000000e+00> : vector<32xf32>
    %111 = vector.multi_reduction <add>, %110, %cst_34 [1] : vector<32x256xf32> to vector<32xf32>
    %112 = vector.shape_cast %111 : vector<32xf32> to vector<32x1xf32>
    %cst_35 = arith.constant 2.560000e+02 : f32
    %113 = vector.broadcast %cst_35 : f32 to vector<32x1xf32>
    %114 = arith.divf %112, %113 : vector<32x1xf32>
    %c0_36 = arith.constant 0 : index
    %c0_37 = arith.constant 0 : index
    %115 = vector.load %arg6[%c0_36, %c0_37] : memref<32x2xf32, #tpu.memory_space<vmem>>, vector<32x2xf32>
    %116 = vector.broadcast %114 : vector<32x1xf32> to vector<32x2xf32>
    %117 = arith.mulf %115, %116 : vector<32x2xf32>
    %cst_38 = arith.constant dense<0.000000e+00> : vector<2xf32>
    %118 = vector.multi_reduction <add>, %117, %cst_38 [0] : vector<32x2xf32> to vector<2xf32>
    %119 = vector.shape_cast %118 : vector<2xf32> to vector<1x2xf32>
    %cst_39 = arith.constant 0.000000e+00 : f32
    %120 = vector.broadcast %cst_39 : f32 to vector<1x2xf32>
    %121 = arith.maximumf %119, %120 : vector<1x2xf32>
    %c0_40 = arith.constant 0 : index
    %c0_41 = arith.constant 0 : index
    %122 = vector.load %arg7[%c0_40, %c0_41] : memref<32x2xf32, #tpu.memory_space<vmem>>, vector<32x2xf32>
    %123 = vector.broadcast %121 : vector<1x2xf32> to vector<32x2xf32>
    %124 = arith.mulf %122, %123 : vector<32x2xf32>
    %cst_42 = arith.constant dense<0.000000e+00> : vector<32xf32>
    %125 = vector.multi_reduction <add>, %124, %cst_42 [1] : vector<32x2xf32> to vector<32xf32>
    %126 = vector.shape_cast %125 : vector<32xf32> to vector<32x1xf32>
    %127 = arith.negf %126 : vector<32x1xf32>
    %128 = math.exp %127 : vector<32x1xf32>
    %cst_43 = arith.constant 1.000000e+00 : f32
    %129 = vector.broadcast %cst_43 : f32 to vector<32x1xf32>
    %130 = arith.addf %129, %128 : vector<32x1xf32>
    %131 = arith.divf %129, %130 : vector<32x1xf32>
    %132 = vector.broadcast %131 : vector<32x1xf32> to vector<32x256xf32>
    %133 = arith.mulf %110, %132 : vector<32x256xf32>
    %134 = arith.addf %133, %1 : vector<32x256xf32>
    %c0_44 = arith.constant 0 : index
    %c0_45 = arith.constant 0 : index
    %c0_46 = arith.constant 0 : index
    %135 = vector.load %arg8[%c0_44, %c0_45, %c0_46] : memref<1x32x256xf32, #tpu.memory_space<vmem>>, vector<1x32x256xf32>
    %136 = vector.shape_cast %135 : vector<1x32x256xf32> to vector<32x256xf32>
    %137 = vector.shape_cast %134 : vector<32x256xf32> to vector<1x32x256xf32>
    tpu.vector_store %arg8[%c0_44, %c0_45, %c0_46], %137 {strides = array<i32>} : memref<1x32x256xf32, #tpu.memory_space<vmem>>, vector<1x32x256xf32>,
    return
  }
  func.func @transform_0(%arg0: i32) -> (i32, i32, i32) {
    %c0_i32 = arith.constant 0 : i32
    %c0_i32_0 = arith.constant 0 : i32
    %c0_i32_1 = arith.constant 0 : i32
    return %arg0, %c0_i32, %c0_i32_0 : i32, i32, i32
  }
  func.func @transform_1(%arg0: i32) -> (i32, i32) {
    %c0_i32 = arith.constant 0 : i32
    %c0_i32_0 = arith.constant 0 : i32
    %c0_i32_1 = arith.constant 0 : i32
    return %c0_i32, %c0_i32_0 : i32, i32
  }
  func.func @transform_2(%arg0: i32) -> (i32, i32) {
    %c0_i32 = arith.constant 0 : i32
    %c0_i32_0 = arith.constant 0 : i32
    %c0_i32_1 = arith.constant 0 : i32
    return %c0_i32, %c0_i32_0 : i32, i32
  }
  func.func @transform_3(%arg0: i32) -> (i32, i32) {
    %c0_i32 = arith.constant 0 : i32
    %c0_i32_0 = arith.constant 0 : i32
    %c0_i32_1 = arith.constant 0 : i32
    return %c0_i32, %c0_i32_0 : i32, i32
  }
  func.func @transform_4(%arg0: i32) -> (i32, i32) {
    %c0_i32 = arith.constant 0 : i32
    %c0_i32_0 = arith.constant 0 : i32
    %c0_i32_1 = arith.constant 0 : i32
    return %c0_i32, %c0_i32_0 : i32, i32
  }
  func.func @transform_5(%arg0: i32) -> (i32, i32) {
    %c0_i32 = arith.constant 0 : i32
    %c0_i32_0 = arith.constant 0 : i32
    %c0_i32_1 = arith.constant 0 : i32
    return %c0_i32, %c0_i32_0 : i32, i32
  }
  func.func @transform_6(%arg0: i32) -> (i32, i32) {
    %c0_i32 = arith.constant 0 : i32
    %c0_i32_0 = arith.constant 0 : i32
    %c0_i32_1 = arith.constant 0 : i32
    return %c0_i32, %c0_i32_0 : i32, i32
  }
  func.func @transform_7(%arg0: i32) -> (i32, i32, i32) {
    %c0_i32 = arith.constant 0 : i32
    %c0_i32_0 = arith.constant 0 : i32
    %c0_i32_1 = arith.constant 0 : i32
    return %arg0, %c0_i32, %c0_i32_0 : i32, i32, i32
  }
}

</mosaic_0001>

<bundles_post_ra>
// kernel: tpu_custom_call.1
= control target key start
LH: loop header
LB: loop body
LE: loop exit
PB: predicated region body
PF: predicated region fallthrough
CT: control target
= control target key end

     0   :  { %12 = vsyncpa [#allocation3], 0  ;;  %s3019_s0 = inlined_call_operand.vmem [shape: f32[2,32,256], index: 0, kind: input, shape index: {}]   ;;  %s3020_s1 = inlined_call_operand.hbm [shape: f32[32,288], index: 1, kind: input, shape index: {}]   ;;  %s3021_s2 = inlined_call_operand.vmem [shape: f32[32,1], index: 2, kind: input, shape index: {}]   ;;  %s3022_s3 = inlined_call_operand.hbm [shape: f32[32,288], index: 3, kind: input, shape index: {}]   ;;  %s3023_s4 = inlined_call_operand.vmem [shape: f32[32,1], index: 4, kind: input, shape index: {}]   ;;  %s3024_s5 = inlined_call_operand.vmem [shape: f32[32,2], index: 5, kind: input, shape index: {}]   ;;  %s3025_s6 = inlined_call_operand.vmem [shape: f32[32,2], index: 6, kind: input, shape index: {}]   ;;  %s3026_s7 = inlined_call_operand.hbm [shape: f32[2,32,256], index: 7, kind: output, shape index: {}]  }
   0x1   :  { %13 = vsyncpa [#allocation6], 0 }
   0x2   :  { %14 = vsyncpa [#allocation4], 0 }
   0x3   :  { %16 = vsyncpa [#allocation4 + $0x1], 0  ;;  %s2006_s24 = smov 0   ;;  %s2008_s25 = smov 0  }
   0x4   :  { %s2010_s26 = smov 0   ;;  %s2012_s27 = smov 0  }
   0x5 LB: > { %s2027_s28 = sadd.s32 4294967295, %s1952_s27   ;;  %s1677_s29 = sadd.s32 4294967294, %s1952_s27   ;;  %s1952_s27 = sphi %s2012_s27, %s3040_s27   ;;  %s1948_s26 = sphi %s2010_s26, %s3039_s26   ;;  %s1944_s25 = sphi %s2008_s25, %s3038_s25   ;;  %s1940_s24 = sphi %s2006_s24, %s3037_s24  }
   0x6   : > { %s2031_s30 = sadd.s32 1, %s1952_s27   ;;  %s181_s8 = sadd.s32 1, %s1948_s26 }
   0x7   : > { %s178_s9 = ssub.s32 %s1952_s27, %s2031_s30  ;;  %p191_p0 = scmp.ne.s32.totalorder %s1948_s26, %s1944_s25 }
   0x8   : > { %p179_p1 = scmp.eq.s32.totalorder %s178_s9, 0  ;;  %p192_p2 = scmp.eq.s32.totalorder %s2027_s28, 1 }
   0x9   : > { %p197_p3 = scmp.ne.s32.totalorder %s1944_s25, %s1940_s24  ;;  %p198_p4 = scmp.eq.s32.totalorder %s1677_s29, 1 }
   0xa   : > { %s2042_s10 = scalar_select %p179_p1, %s1948_s26, %s181_s8  }
   0xb   : > { %p2044_p5 = por %p192_p2, %p191_p0  ;;  %p2048_p6 = por %p198_p4, %p197_p3 }
   0xc   : > { %p1678_p7 = scmp.ge.s32.totalorder %s1952_s27, 1  ;;  %p205_p8 = scmp.lt.s32.totalorder %s1952_s27, 3 }
   0xd   : > { %s3029_s12 = scalar_select %p2048_p6, 1, 0 }
   0xe   : > { %p3027_p9 = scmp.eq.s32.totalorder %s2027_s28, 0  ;;  %p2055_p10 = pnand %p1678_p7, %p205_p8 }
   0xf   : > { %s1954_s14 = smov [#allocation2]   ;;  %s1955_s17 = smov [#allocation5]  }
  0x10   : > { %s217_s15 = sshll.u32 %s1954_s14, 4  ;;  %p1731_p11 = pneg %p2055_p10  ;;  %s218_s15 = int_to_ptr.vmem [resolvable:$true] %s217_s15 }
  0x11   : > { %s233_s18 = sshll.u32 %s1955_s17, 4  ;;  %s1843_s19 = scalar_lea.vmem %s218_s15, 1536  ;;  %s234_s18 = int_to_ptr.vmem [resolvable:$true] %s233_s18 }
  0x12   : > { %p2063_p12 = pnand %p3027_p9, %p1731_p11  ;;  %p1844_p0 = scmp.ne.s32.totalorder %s218_s15, %s1843_s19 }
  0x13   : > { %p1851_p3 = scmp.lt.s32.totalorder %s218_s15, %s218_s15  ;;  %p1852_p4 = scmp.lt.s32.totalorder %s1843_s19, %s1843_s19 }
  0x14   : > { %p1834_p13 = pneg %p2063_p12 }
  0x15   : > { %p1853_p7 = por %p1852_p4, %p1851_p3 }
  0x16   : > { %p1846_p1 = pnand %p1844_p0, %p1834_p13 }
  0x18   : > { %p1847_p2 = pneg %p1846_p1 }
  0x1a   : > { %p1854_p8 = pnand %p1853_p7, %p1847_p2 }
  0x1c   : > { %1857 = shalt.err (!%p1854_p8)
}
  0x1d   : > { %s1956_s20 = smov 384   ;;  %s1957_s21 = smov 24  }
  0x1e   : > { %1734 = dma.hbm_to_vmem [thread:$0]  (!%p2063_p12), %s3020_s1, 1536, %s218_s15, [#allocation3], %s1956_s20, %s1956_s20, %s1957_s21  }
  0x1f   : > { %s1869_s29 = scalar_lea.vmem %s234_s18, 1536  ;;  %p1877_p9 = scmp.lt.s32.totalorder %s234_s18, %s234_s18 }
  0x20   : > { %p1870_p11 = scmp.ne.s32.totalorder %s234_s18, %s1869_s29  ;;  %p1878_p6 = scmp.lt.s32.totalorder %s1869_s29, %s1869_s29 }
  0x22   : > { %p1872_p0 = pnand %p1870_p11, %p1834_p13  ;;  %p1879_p3 = por %p1878_p6, %p1877_p9 }
  0x24   : > { %p1873_p1 = pneg %p1872_p0 }
  0x26   : > { %p1880_p2 = pnand %p1879_p3, %p1873_p1 }
  0x28   : > { %1883 = shalt.err (!%p1880_p2)
}
  0x29   : > { %1737 = dma.hbm_to_vmem [thread:$0]  (!%p2063_p12), %s3022_s3, 1536, %s234_s18, [#allocation6], %s1956_s20, %s1956_s20, %s1957_s21  }
  0x2a   : > { %266 = sbr.rel (%p2055_p10) target bundleno = 2088 (0x828), region = 48  ;;  %p3032_p4 = scmp.eq.s32.totalorder (!%p2055_p10), %s2027_s28, 0 }
  0x2f   : > { %1927 = dma.done.wait (%p3032_p4), [#allocation3], 1536   ;;  %p3033_p13 = pmov %p3032_p4 }
  0x30   : > { %p3034_p7 = pmov %p3032_p4 }
  0x31   : > { %1929 = vsyncadd (%p3033_p13), [#allocation3], 4294965760 }
  0x32   : > { %1931 = dma.done.wait (%p3034_p7), [#allocation6], 1536   ;;  %p3035_p6 = pmov %p3032_p4 }
  0x33   : > { %p302_p9 = scmp.lt.s32.totalorder %s2027_s28, 1  ;;  %v1958_v0 = vmov 0.0   ;;  %s1959_s18 = smov 127   ;;  %v315_v9 = vlaneseq  ;;  %vm662_vm10 = vcmask 261120   ;;  %vm1496_vm11 = vcmask 15360  }
  0x34   : > { %1933 = vsyncadd (%p3035_p6), [#allocation6], 4294965760  ;;  %828 = vmatprep.mubr.f32.mxu1 %v1958_v0  ;;  %s1960_s19 = smov 1   ;;  %s1961_s20 = smov 16  }
  0x35   : > { %s303_s13 = scalar_select %p302_p9, %s2027_s28, 1  ;;  %v2191_v10 = vand.u32 127, %v315_v9 }
  0x36   : > { %s1962_s21 = smov 112   ;;  %s299_s16 = sand.u32 1, %s1944_s25  }
  0x37   : > { %s1711_s14 = sshll.u32 %s303_s13, 6  ;;  %v2194_v11 = vadd.s32 128, %v2191_v10  ;;  %v322_v13 = vand.u32 15, %v2191_v10  ;;  %vm415_vm2 = vcmp.lt.s32.totalorder %v2191_v10, 127  ;;  %vm382_vm5 = vcmp.lt.s32.totalorder %v2191_v10, 1  ;;  %s2978_s9 = scalar_lea.sflag [#allocation4], %s299_s16 }
  0x38   : > { %s2101_s17 = scalar_lea.vmem %s3019_s0, %s1711_s14  ;;  %vm354_vm6 = vcmp.ge.s32.totalorder %v2191_v10, 16  ;;  %vm480_vm7 = vcmp.lt.s32.totalorder %v2191_v10, 16  ;;  %vm577_vm8 = vcmp.lt.s32.totalorder %v2191_v10, 112  ;;  %v1189_v10 = vld [vmem:[#allocation5 + $0x38] sm:$0xff]  ;;  %s1964_s13 = smov [#allocation7]  }
  0x39   : > { %v2104_v1 = vld [vmem:[%s2101_s17 + $0x30] sm:$0xff]  ;;  %v2107_v2 = vld [vmem:[%s2101_s17 + $0x20] sm:$0xff]  ;;  %v2114_v3 = vld [vmem:[%s2101_s17 + $0x38] sm:$0xff]  ;;  %v329_v12 = vand.u32 15, %v2194_v11  ;;  %vm348_vm1 = vcmp.ne.s32.totalorder %v322_v13, 15  ;;  %vm342_vm4 = vcmp.ne.s32.totalorder %v322_v13, 0 }
  0x3a   : > { %405 = vrot.lane.b32.xlu0 %v2104_v1, %s1959_s18  ;;  %403 = vrot.lane.b32.xlu1 %v2107_v2, %s1959_s18  ;;  %v2117_v4 = vld [vmem:[%s2101_s17 + $0x28] sm:$0xff]  ;;  %v2124_v5 = vld [vmem:[%s2101_s17 + $0x18] sm:$0xff]  ;;  %v2203_v17 = vsel %vm348_vm1, 1.0, %v1958_v0  ;;  %v2252_v39 = vsel %vm342_vm4, 1.0, %v1958_v0  ;;  %vm361_vm9 = vcmp.lt.s32.totalorder %v2194_v11, 240 }
  0x3b   : > { %v2127_v6 = vld [vmem:[%s2101_s17 + $0x10] sm:$0xff]  ;;  %v2134_v7 = vld [vmem:[%s2101_s17 + $0x8] sm:$0xff]  ;;  %v2137_v8 = vld [vmem:[%s2101_s17] sm:$0xff]  ;;  %vm349_vm0 = vcmp.ne.s32.totalorder %v329_v12, 15  ;;  %vm343_vm3 = vcmp.ne.s32.totalorder %v329_v12, 0 }
  0x3c   : > { %v2200_v16 = vsel %vm349_vm0, 1.0, %v1958_v0  ;;  %v2249_v38 = vsel %vm343_vm3, 1.0, %v1958_v0  ;;  %v627_v13 = vld [vmem:[#allocation2 + $0x8] sm:$0xff] }
  0x3d   : > { %739 = vmatprep.mubr.f32.mxu0 %v627_v13 }
  0x3e   : > { %413 = vrot.lane.b32.xlu0 %v2114_v3, %s1959_s18  ;;  %411 = vrot.lane.b32.xlu1 %v2117_v4, %s1959_s18 }
  0x42   : > { %409 = vrot.lane.b32.xlu1 %v2124_v5, %s1959_s18  ;;  %401 = vrot.lane.b32.xlu0 %v2127_v6, %s1959_s18 }
  0x46   : > { %407 = vrot.lane.b32.xlu1 %v2134_v7, %s1959_s18  ;;  %399 = vrot.lane.b32.xlu0 %v2137_v8, %s1959_s18 }
  0x4a   : > { %380 = vrot.lane.b32.xlu1 %v2114_v3, %s1960_s19  ;;  %372 = vrot.lane.b32.xlu0 %v2104_v1, %s1960_s19 }
  0x4e   : > { %378 = vrot.lane.b32.xlu1 %v2117_v4, %s1960_s19  ;;  %370 = vrot.lane.b32.xlu0 %v2107_v2, %s1960_s19 }
  0x52   : > { %376 = vrot.lane.b32.xlu1 %v2124_v5, %s1960_s19  ;;  %368 = vrot.lane.b32.xlu0 %v2127_v6, %s1960_s19 }
  0x56   : > { %374 = vrot.lane.b32.xlu1 %v2134_v7, %s1960_s19  ;;  %366 = vrot.lane.b32.xlu0 %v2137_v8, %s1960_s19 }
  0x5a   : > { %470 = vrot.lane.b32.xlu1 %v2114_v3, %s1961_s20  ;;  %446 = vrot.lane.b32.xlu0 %v2104_v1, %s1961_s20 }
  0x5e   : > { %468 = vrot.lane.b32.xlu1 %v2117_v4, %s1961_s20  ;;  %444 = vrot.lane.b32.xlu0 %v2107_v2, %s1961_s20 }
  0x62   : > { %466 = vrot.lane.b32.xlu1 %v2124_v5, %s1961_s20  ;;  %442 = vrot.lane.b32.xlu0 %v2127_v6, %s1961_s20 }
  0x66   : > { %464 = vrot.lane.b32.xlu1 %v2134_v7, %s1961_s20  ;;  %440 = vrot.lane.b32.xlu0 %v2137_v8, %s1961_s20 }
  0x6a   : > { %567 = vrot.lane.b32.xlu1 %v2114_v3, %s1962_s21  ;;  %543 = vrot.lane.b32.xlu0 %v2104_v1, %s1962_s21 }
  0x6e   : > { %565 = vrot.lane.b32.xlu1 %v2117_v4, %s1962_s21  ;;  %541 = vrot.lane.b32.xlu0 %v2107_v2, %s1962_s21 }
  0x72   : > { %563 = vrot.lane.b32.xlu1 %v2124_v5, %s1962_s21  ;;  %539 = vrot.lane.b32.xlu0 %v2127_v6, %s1962_s21 }
  0x76   : > { %561 = vrot.lane.b32.xlu1 %v2134_v7, %s1962_s21  ;;  %537 = vrot.lane.b32.xlu0 %v2137_v8, %s1962_s21 }
  0xac   : > { %v406_v14 = vpop.permute.xlu0 %405  ;;  %v404_v15 = vpop.permute.xlu1 %403 }
  0xb0   : > { %v414_v18 = vpop.permute.xlu0 %413  ;;  %v412_v19 = vpop.permute.xlu1 %411 }
  0xb1   : > { %v419_v20 = vsel %vm415_vm2, %v406_v14, %v414_v18  ;;  %v423_v21 = vsel %vm415_vm2, %v414_v18, %v406_v14  ;;  %v418_v24 = vsel %vm415_vm2, %v404_v15, %v412_v19  ;;  %v422_v25 = vsel %vm415_vm2, %v412_v19, %v404_v15  ;;  %v641_v14 = vld [vmem:[%s3021_s2 + $0x18] sm:$0xff]  ;;  %v640_v15 = vld [vmem:[%s3021_s2 + $0x10] sm:$0xff] }
  0xb2   : > { %v2210_v22 = vmul.f32 %v2200_v16, %v423_v21  ;;  %v2213_v23 = vmul.f32 %v2203_v17, %v419_v20  ;;  %v2228_v30 = vmul.f32 %v2200_v16, %v422_v25  ;;  %v2231_v31 = vmul.f32 %v2203_v17, %v418_v24  ;;  %v638_v21 = vld [vmem:[%s3021_s2] sm:$0xff]  ;;  %v639_v24 = vld [vmem:[%s3021_s2 + $0x8] sm:$0xff] }
  0xb3   : > { %v1963_v18 = vmov 0  }
  0xb4   : > { %478 = vrot.lane.b32.xlu1 %v2210_v22, %s1961_s20  ;;  %454 = vrot.lane.b32.xlu0 %v2213_v23, %s1961_s20  ;;  %v410_v26 = vpop.permute.xlu1 %409  ;;  %v402_v27 = vpop.permute.xlu0 %401 }
  0xb5   : > { %v417_v28 = vsel %vm415_vm2, %v402_v27, %v410_v26  ;;  %v421_v29 = vsel %vm415_vm2, %v410_v26, %v402_v27  ;;  %1790 = vset.pattern.permute.xlu0 %v1963_v18  ;;  %1791 = vset.pattern.permute.xlu1 %v1963_v18 }
  0xb6   : > { %v2238_v34 = vmul.f32 %v2200_v16, %v421_v29  ;;  %v2241_v35 = vmul.f32 %v2203_v17, %v417_v28 }
  0xb8   : > { %476 = vrot.lane.b32.xlu1 %v2228_v30, %s1961_s20  ;;  %452 = vrot.lane.b32.xlu0 %v2231_v31, %s1961_s20  ;;  %v408_v32 = vpop.permute.xlu1 %407  ;;  %v400_v33 = vpop.permute.xlu0 %399 }
  0xb9   : > { %v416_v36 = vsel %vm415_vm2, %v400_v33, %v408_v32  ;;  %v420_v37 = vsel %vm415_vm2, %v408_v32, %v400_v33 }
  0xba   : > { %v2259_v42 = vmul.f32 %v2200_v16, %v420_v37  ;;  %v2262_v43 = vmul.f32 %v2203_v17, %v416_v36 }
  0xbc   : > { %474 = vrot.lane.b32.xlu1 %v2238_v34, %s1961_s20  ;;  %450 = vrot.lane.b32.xlu0 %v2241_v35, %s1961_s20  ;;  %v381_v40 = vpop.permute.xlu1 %380  ;;  %v373_v41 = vpop.permute.xlu0 %372 }
  0xbd   : > { %v386_v44 = vsel %vm382_vm5, %v373_v41, %v381_v40  ;;  %v390_v45 = vsel %vm382_vm5, %v381_v40, %v373_v41 }
  0xbe   : > { %v398_v46 = vmul.f32 %v2249_v38, %v386_v44  ;;  %v397_v47 = vmul.f32 %v2252_v39, %v390_v45 }
  0xc0   : > { %472 = vrot.lane.b32.xlu1 %v2259_v42, %s1961_s20  ;;  %448 = vrot.lane.b32.xlu0 %v2262_v43, %s1961_s20  ;;  %v379_v48 = vpop.permute.xlu1 %378  ;;  %v371_v49 = vpop.permute.xlu0 %370 }
  0xc1   : > { %675 = vmatprep.subr.mxu0 %v398_v46  ;;  %v385_v50 = vsel %vm382_vm5, %v371_v49, %v379_v48  ;;  %v389_v51 = vsel %vm382_vm5, %v379_v48, %v371_v49  ;;  %v2357_v49 = vsel %vm354_vm6, 1.0, %v1958_v0 }
  0xc2   : > { %676 = vmatpush1.msra.mxu0 %v397_v47  ;;  %v396_v52 = vmul.f32 %v2249_v38, %v385_v50  ;;  %v395_v53 = vmul.f32 %v2252_v39, %v389_v51 }
  0xc4   : > { %438 = vrot.lane.b32.xlu0 %v397_v47, %s1961_s20  ;;  %462 = vrot.lane.b32.xlu1 %v398_v46, %s1961_s20  ;;  %v377_v54 = vpop.permute.xlu1 %376  ;;  %v369_v55 = vpop.permute.xlu0 %368 }
  0xc5   : > { %677 = vmatprep.subr.mxu0 %v396_v52  ;;  %v384_v56 = vsel %vm382_vm5, %v369_v55, %v377_v54  ;;  %v388_v57 = vsel %vm382_vm5, %v377_v54, %v369_v55 }
  0xc6   : > { %678 = vmatpush1.msra.mxu0 %v395_v53  ;;  %v394_v58 = vmul.f32 %v2249_v38, %v384_v56  ;;  %v393_v59 = vmul.f32 %v2252_v39, %v388_v57 }
  0xc8   : > { %436 = vrot.lane.b32.xlu0 %v395_v53, %s1961_s20  ;;  %460 = vrot.lane.b32.xlu1 %v396_v52, %s1961_s20  ;;  %v375_v60 = vpop.permute.xlu1 %374  ;;  %v367_v61 = vpop.permute.xlu0 %366 }
  0xc9   : > { %679 = vmatprep.subr.mxu0 %v394_v58  ;;  %v383_v62 = vsel %vm382_vm5, %v367_v61, %v375_v60  ;;  %v387_v63 = vsel %vm382_vm5, %v375_v60, %v367_v61 }
  0xca   : > { %680 = vmatpush1.msra.mxu0 %v393_v59  ;;  %v392_v9 = vmul.f32 %v2249_v38, %v383_v62  ;;  %v391_v12 = vmul.f32 %v2252_v39, %v387_v63 }
  0xcc   : > { %434 = vrot.lane.b32.xlu0 %v393_v59, %s1961_s20  ;;  %458 = vrot.lane.b32.xlu1 %v394_v58, %s1961_s20  ;;  %v471_v19 = vpop.permute.xlu1 %470  ;;  %v447_v20 = vpop.permute.xlu0 %446 }
  0xcd   : > { %681 = vmatprep.subr.mxu0 %v392_v9 }
  0xce   : > { %682 = vmatpush1.msra.mxu0 %v391_v12 }
  0xd0   : > { %432 = vrot.lane.b32.xlu0 %v391_v12, %s1961_s20  ;;  %456 = vrot.lane.b32.xlu1 %v392_v9, %s1961_s20  ;;  %v469_v25 = vpop.permute.xlu1 %468  ;;  %v445_v26 = vpop.permute.xlu0 %444 }
  0xd1   : > { %v499_v18 = vsel %vm480_vm7, %v469_v25, %v445_v26 }
  0xd4   : > { %535 = vrot.lane.b32.xlu0 %v397_v47, %s1962_s21  ;;  %559 = vrot.lane.b32.xlu1 %v398_v46, %s1962_s21  ;;  %v467_v27 = vpop.permute.xlu1 %466  ;;  %v443_v28 = vpop.permute.xlu0 %442 }
  0xd8   : > { %533 = vrot.lane.b32.xlu0 %v395_v53, %s1962_s21  ;;  %557 = vrot.lane.b32.xlu1 %v396_v52, %s1962_s21  ;;  %v2336_v29 = vpop.permute.xlu1 %464  ;;  %v441_v32 = vpop.permute.xlu0 %440 }
  0xdc   : > { %531 = vrot.lane.b32.xlu0 %v393_v59, %s1962_s21  ;;  %555 = vrot.lane.b32.xlu1 %v394_v58, %s1962_s21  ;;  %v2338_v33 = vpop.permute.xlu1 %567  ;;  %v2340_v36 = vpop.permute.xlu0 %543 }
  0xe0   : > { %529 = vrot.lane.b32.xlu0 %v391_v12, %s1962_s21  ;;  %553 = vrot.lane.b32.xlu1 %v392_v9, %s1962_s21  ;;  %v2342_v37 = vpop.permute.xlu1 %565  ;;  %v2344_v40 = vpop.permute.xlu0 %541  ;;  %v500_v12 = vsel %vm480_vm7, %v471_v19, %v447_v20 }
  0xe4   : > { %551 = vrot.lane.b32.xlu0 %v2213_v23, %s1962_s21  ;;  %575 = vrot.lane.b32.xlu1 %v2210_v22, %s1962_s21  ;;  %v2346_v41 = vpop.permute.xlu1 %563  ;;  %v2348_v44 = vpop.permute.xlu0 %539 }
  0xe8   : > { %549 = vrot.lane.b32.xlu0 %v2231_v31, %s1962_s21  ;;  %573 = vrot.lane.b32.xlu1 %v2228_v30, %s1962_s21  ;;  %v2350_v45 = vpop.permute.xlu1 %561  ;;  %v2352_v46 = vpop.permute.xlu0 %537 }
  0xec   : > { %547 = vrot.lane.b32.xlu0 %v2241_v35, %s1962_s21  ;;  %571 = vrot.lane.b32.xlu1 %v2238_v34, %s1962_s21 }
  0xf0   : > { %545 = vrot.lane.b32.xlu0 %v2262_v43, %s1962_s21  ;;  %569 = vrot.lane.b32.xlu1 %v2259_v42, %s1962_s21 }
  0xf4   : > { %659 = vperm.xlu0 %1790, %v641_v14   ;;  %654 = vperm.xlu1 %1791, %v640_v15  }
  0xf8   : > { %644 = vperm.xlu0 %1790, %v638_v21   ;;  %649 = vperm.xlu1 %1791, %v639_v24  }
 0x126   : > { %v479_v47 = vpop.permute.xlu1 %478  ;;  %v455_v48 = vpop.permute.xlu0 %454 }
 0x127   : > { %v504_v50 = vsel %vm480_vm7, %v479_v47, %v455_v48  ;;  %v492_v51 = vsel %vm480_vm7, %v455_v48, %v479_v47  ;;  %v488_v47 = vsel %vm480_vm7, %v447_v20, %v471_v19  ;;  %v519_v48 = vmul.f32 %v2357_v49, %v500_v12 }
 0x128   : > { %683 = vmatprep.subr.mxu0 %v492_v51  ;;  %v527_v52 = vmul.f32 %v2357_v49, %v504_v50  ;;  %v498_v50 = vsel %vm480_vm7, %v467_v27, %v443_v28  ;;  %v487_v51 = vsel %vm480_vm7, %v445_v26, %v469_v25  ;;  %v486_v20 = vsel %vm480_vm7, %v443_v28, %v467_v27 }
 0x129   : > { %v485_v25 = vsel %vm480_vm7, %v441_v32, %v2336_v29 }
 0x12a   : > { %v477_v53 = vpop.permute.xlu1 %476  ;;  %684 = vmatpush1.msra.mxu0 %v527_v52  ;;  %v453_v54 = vpop.permute.xlu0 %452  ;;  %v517_v52 = vmul.f32 %v2357_v49, %v499_v18 }
 0x12b   : > { %v503_v55 = vsel %vm480_vm7, %v477_v53, %v453_v54  ;;  %v491_v56 = vsel %vm480_vm7, %v453_v54, %v477_v53  ;;  %v497_v53 = vsel %vm480_vm7, %v2336_v29, %v441_v32 }
 0x12c   : > { %685 = vmatprep.subr.mxu0 %v491_v56  ;;  %v525_v57 = vmul.f32 %v2357_v49, %v503_v55  ;;  %v515_v55 = vmul.f32 %v2357_v49, %v498_v50  ;;  %v513_v26 = vmul.f32 %v2357_v49, %v497_v53  ;;  %v585_v50 = vsel %vm577_vm8, %v2340_v36, %v2338_v33 }
 0x12d   : > { %v584_v53 = vsel %vm577_vm8, %v2344_v40, %v2342_v37 }
 0x12e   : > { %v475_v58 = vpop.permute.xlu1 %474  ;;  %686 = vmatpush1.msra.mxu0 %v525_v57  ;;  %v451_v59 = vpop.permute.xlu0 %450 }
 0x12f   : > { %v502_v60 = vsel %vm480_vm7, %v475_v58, %v451_v59  ;;  %v490_v61 = vsel %vm480_vm7, %v451_v59, %v475_v58 }
 0x130   : > { %687 = vmatprep.subr.mxu0 %v490_v61  ;;  %v523_v62 = vmul.f32 %v2357_v49, %v502_v60  ;;  %v2416_v61 = vsel %vm361_vm9, 1.0, %v1958_v0 }
 0x132   : > { %v473_v63 = vpop.permute.xlu1 %472  ;;  %688 = vmatpush1.msra.mxu0 %v523_v62  ;;  %v449_v9 = vpop.permute.xlu0 %448  ;;  %v597_v62 = vsel %vm577_vm8, %v2338_v33, %v2340_v36 }
 0x133   : > { %v501_v13 = vsel %vm480_vm7, %v473_v63, %v449_v9  ;;  %v489_v14 = vsel %vm480_vm7, %v449_v9, %v473_v63 }
 0x134   : > { %689 = vmatprep.subr.mxu0 %v489_v14  ;;  %v521_v15 = vmul.f32 %v2357_v49, %v501_v13 }
 0x136   : > { %v463_v21 = vpop.permute.xlu1 %462  ;;  %690 = vmatpush1.msra.mxu0 %v521_v15  ;;  %v439_v24 = vpop.permute.xlu0 %438  ;;  %v596_v15 = vsel %vm577_vm8, %v2342_v37, %v2344_v40  ;;  %v582_v37 = vsel %vm577_vm8, %v2352_v46, %v2350_v45 }
 0x137   : > { %691 = vmatprep.subr.mxu0 %v488_v47  ;;  %v496_v56 = vsel %vm480_vm7, %v463_v21, %v439_v24  ;;  %v484_v28 = vsel %vm480_vm7, %v439_v24, %v463_v21  ;;  %v617_v21 = vmul.f32 %v2416_v61, %v597_v62  ;;  %v595_v24 = vsel %vm577_vm8, %v2346_v41, %v2348_v44 }
 0x138   : > { %692 = vmatpush1.msra.mxu0 %v519_v48  ;;  %v511_v59 = vmul.f32 %v2357_v49, %v496_v56 }
 0x139   : > { %693 = vmatprep.subr.mxu0 %v487_v51  ;;  %v615_v51 = vmul.f32 %v2416_v61, %v596_v15 }
 0x13a   : > { %v461_v54 = vpop.permute.xlu1 %460  ;;  %694 = vmatpush1.msra.mxu0 %v517_v52  ;;  %v437_v19 = vpop.permute.xlu0 %436  ;;  %v594_v52 = vsel %vm577_vm8, %v2350_v45, %v2352_v46 }
 0x13b   : > { %695 = vmatprep.subr.mxu0 %v486_v20  ;;  %v495_v57 = vsel %vm480_vm7, %v461_v54, %v437_v19  ;;  %v483_v32 = vsel %vm480_vm7, %v437_v19, %v461_v54  ;;  %v613_v54 = vmul.f32 %v2416_v61, %v595_v24  ;;  %v583_v20 = vsel %vm577_vm8, %v2348_v44, %v2346_v41  ;;  %v630_v24 = vld [vmem:[#allocation2 + $0x20] sm:$0xff] }
 0x13c   : > { %696 = vmatpush1.msra.mxu0 %v515_v55  ;;  %v509_v60 = vmul.f32 %v2357_v49, %v495_v57  ;;  %v611_v55 = vmul.f32 %v2416_v61, %v594_v52 }
 0x13d   : > { %697 = vmatprep.subr.mxu0 %v485_v25 }
 0x13e   : > { %v459_v58 = vpop.permute.xlu1 %458  ;;  %698 = vmatpush1.msra.mxu0 %v513_v26  ;;  %v435_v27 = vpop.permute.xlu0 %434 }
 0x13f   : > { %v494_v29 = vsel %vm480_vm7, %v459_v58, %v435_v27  ;;  %699 = vmatprep.subr.mxu0 %v484_v28  ;;  %v482_v9 = vsel %vm480_vm7, %v435_v27, %v459_v58 }
 0x140   : > { %700 = vmatpush1.msra.mxu0 %v511_v59  ;;  %v507_v12 = vmul.f32 %v2357_v49, %v494_v29 }
 0x141   : > { %701 = vmatprep.subr.mxu0 %v483_v32 }
 0x142   : > { %v457_v11 = vpop.permute.xlu1 %456  ;;  %702 = vmatpush1.msra.mxu0 %v509_v60  ;;  %v433_v63 = vpop.permute.xlu0 %432 }
 0x143   : > { %v493_v13 = vsel %vm480_vm7, %v457_v11, %v433_v63  ;;  %703 = vmatprep.subr.mxu0 %v482_v9  ;;  %v481_v14 = vsel %vm480_vm7, %v433_v63, %v457_v11 }
 0x144   : > { %704 = vmatpush1.msra.mxu0 %v507_v12  ;;  %v505_v18 = vmul.f32 %v2357_v49, %v493_v13 }
 0x145   : > { %705 = vmatprep.subr.mxu0 %v481_v14 }
 0x146   : > { %v560_v47 = vpop.permute.xlu1 %559  ;;  %706 = vmatpush1.msra.mxu0 %v505_v18  ;;  %v536_v48 = vpop.permute.xlu0 %535 }
 0x147   : > { %707 = vmatprep.subr.mxu0 %v617_v21  ;;  %v593_v19 = vsel %vm577_vm8, %v560_v47, %v536_v48  ;;  %v581_v44 = vsel %vm577_vm8, %v536_v48, %v560_v47  ;;  %v634_v47 = vld [vmem:[#allocation2 + $0x40] sm:$0xff]  ;;  %v636_v48 = vld [vmem:[#allocation2 + $0x50] sm:$0xff] }
 0x148   : > { %708 = vmatpush2.msra.mxu0 %v585_v50  ;;  %v609_v40 = vmul.f32 %v2416_v61, %v593_v19  ;;  %v637_v50 = vld [vmem:[#allocation2 + $0x58] sm:$0xff] }
 0x149   : > { %709 = vmatprep.subr.mxu0 %v615_v51 }
 0x14a   : > { %v558_v33 = vpop.permute.xlu1 %557  ;;  %710 = vmatpush2.msra.mxu0 %v584_v53  ;;  %v534_v36 = vpop.permute.xlu0 %533 }
 0x14b   : > { %711 = vmatprep.subr.mxu0 %v613_v54  ;;  %v592_v56 = vsel %vm577_vm8, %v558_v33, %v534_v36  ;;  %v580_v45 = vsel %vm577_vm8, %v534_v36, %v558_v33 }
 0x14c   : > { %712 = vmatpush2.msra.mxu0 %v583_v20  ;;  %v607_v57 = vmul.f32 %v2416_v61, %v592_v56 }
 0x14d   : > { %713 = vmatprep.subr.mxu0 %v611_v55 }
 0x14e   : > { %v556_v25 = vpop.permute.xlu1 %555  ;;  %714 = vmatpush2.msra.mxu0 %v582_v37  ;;  %v532_v26 = vpop.permute.xlu0 %531 }
 0x14f   : > { %v591_v41 = vsel %vm577_vm8, %v556_v25, %v532_v26  ;;  %715 = vmatprep.subr.mxu0 %v609_v40  ;;  %v579_v59 = vsel %vm577_vm8, %v532_v26, %v556_v25 }
 0x150   : > { %716 = vmatpush2.msra.mxu0 %v581_v44  ;;  %v605_v58 = vmul.f32 %v2416_v61, %v591_v41 }
 0x151   : > { %717 = vmatprep.subr.mxu0 %v607_v57 }
 0x152   : > { %v554_v46 = vpop.permute.xlu1 %553  ;;  %718 = vmatpush2.msra.mxu0 %v580_v45  ;;  %v530_v27 = vpop.permute.xlu0 %529 }
 0x153   : > { %v590_v28 = vsel %vm577_vm8, %v554_v46, %v530_v27  ;;  %719 = vmatprep.subr.mxu0 %v605_v58  ;;  %v578_v62 = vsel %vm577_vm8, %v530_v27, %v554_v46 }
 0x154   : > { %720 = vmatpush2.msra.mxu0 %v579_v59  ;;  %v603_v29 = vmul.f32 %v2416_v61, %v590_v28 }
 0x156   : > { %v576_v32 = vpop.permute.xlu1 %575  ;;  %721 = vmatprep.subr.mxu0 %v603_v29  ;;  %v552_v60 = vpop.permute.xlu0 %551 }
 0x157   : > { %722 = vmatpush2.msra.mxu0 %v578_v62  ;;  %v601_v11 = vsel %vm577_vm8, %v576_v32, %v552_v60  ;;  %v589_v13 = vsel %vm577_vm8, %v552_v60, %v576_v32 }
 0x158   : > { %723 = vmatprep.subr.mxu0 %v2210_v22  ;;  %v625_v63 = vmul.f32 %v2416_v61, %v601_v11 }
 0x159   : > { %724 = vmatpush2.msra.mxu0 %v2213_v23 }
 0x15a   : > { %v574_v9 = vpop.permute.xlu1 %573  ;;  %725 = vmatprep.subr.mxu0 %v2228_v30  ;;  %788 = vmatprep.subr.mxu1 %v625_v63  ;;  %v550_v12 = vpop.permute.xlu0 %549 }
 0x15b   : > { %v600_v14 = vsel %vm577_vm8, %v574_v9, %v550_v12  ;;  %726 = vmatpush2.msra.mxu0 %v2231_v31  ;;  %789 = vmatpush1.msra.mxu1 %v589_v13  ;;  %v588_v15 = vsel %vm577_vm8, %v550_v12, %v574_v9 }
 0x15c   : > { %727 = vmatprep.subr.mxu0 %v2238_v34  ;;  %v623_v22 = vmul.f32 %v2416_v61, %v600_v14 }
 0x15d   : > { %728 = vmatpush2.msra.mxu0 %v2241_v35 }
 0x15e   : > { %v572_v23 = vpop.permute.xlu1 %571  ;;  %729 = vmatprep.subr.mxu0 %v2259_v42  ;;  %790 = vmatprep.subr.mxu1 %v623_v22  ;;  %v548_v30 = vpop.permute.xlu0 %547 }
 0x15f   : > { %v599_v18 = vsel %vm577_vm8, %v572_v23, %v548_v30  ;;  %730 = vmatpush2.msra.mxu0 %v2262_v43  ;;  %791 = vmatpush1.msra.mxu1 %v588_v15  ;;  %v587_v42 = vsel %vm577_vm8, %v548_v30, %v572_v23  ;;  %v628_v43 = vld [vmem:[#allocation2 + $0x10] sm:$0xff] }
 0x160   : > { %731 = vmatprep.subr.mxu0 %v2114_v3  ;;  %v621_v31 = vmul.f32 %v2416_v61, %v599_v18 }
 0x161   : > { %732 = vmatpush2.msra.mxu0 %v2104_v1  ;;  %v626_v1 = vld [vmem:[#allocation2] sm:$0xff] }
 0x162   : > { %v570_v34 = vpop.permute.xlu1 %569  ;;  %733 = vmatprep.subr.mxu0 %v2117_v4  ;;  %792 = vmatprep.subr.mxu1 %v621_v31  ;;  %v546_v35 = vpop.permute.xlu0 %545 }
 0x163   : > { %v598_v21 = vsel %vm577_vm8, %v570_v34, %v546_v35  ;;  %734 = vmatpush2.msra.mxu0 %v2107_v2  ;;  %793 = vmatpush1.msra.mxu1 %v587_v42  ;;  %v586_v4 = vsel %vm577_vm8, %v546_v35, %v570_v34  ;;  %v629_v2 = vld [vmem:[#allocation2 + $0x18] sm:$0xff] }
 0x164   : > { %v619_v3 = vmul.f32 %v2416_v61, %v598_v21  ;;  %735 = vmatprep.subr.mxu0 %v2124_v5  ;;  %v631_v5 = vld [vmem:[#allocation2 + $0x28] sm:$0xff] }
 0x165   : > { %736 = vmatpush2.msra.mxu0 %v2127_v6  ;;  %v633_v6 = vld [vmem:[#allocation2 + $0x38] sm:$0xff] }
 0x166   : > { %737 = vmatprep.subr.mxu0 %v2134_v7  ;;  %794 = vmatprep.subr.mxu1 %v619_v3  ;;  %v632_v7 = vld [vmem:[#allocation2 + $0x30] sm:$0xff] }
 0x167   : > { %738 = vmatpush2.msra.mxu0 %v2137_v8  ;;  %795 = vmatpush1.msra.mxu1 %v586_v4  ;;  %v635_v8 = vld [vmem:[#allocation2 + $0x48] sm:$0xff] }
 0x168   : > { %740 = vmatmul.mubr.f32.vlgmr.msra.gmra.mxu0 %v626_v1  ;;  %1694 = vmatmul.mubr.msk.f32.vlgmr.msra.gmra.mxu1 %vm662_vm10, %v628_v43 }
 0x169   : > { %745 = vmatprep.mubr.f32.mxu0 %v630_v24  ;;  %834 = vmatprep.mubr.f32.mxu1 %v1958_v0 }
 0x16c   : > { %746 = vmatmul.mubr.f32.gmra.mxu0 %v629_v2  ;;  %1695 = vmatmul.mubr.msk.f32.gmra.mxu1 %vm662_vm10, %v631_v5 }
 0x16d   : > { %751 = vmatprep.mubr.f32.mxu0 %v633_v6  ;;  %840 = vmatprep.mubr.f32.mxu1 %v1958_v0 }
 0x16f   : > { %v655_v19 = vpop.permute.xlu1 %654  ;;  %v660_v56 = vpop.permute.xlu0 %659 }
 0x170   : > { %752 = vmatmul.mubr.f32.gmra.mxu0 %v632_v7  ;;  %1696 = vmatmul.mubr.msk.f32.gmra.mxu1 %vm662_vm10, %v634_v47 }
 0x171   : > { %757 = vmatprep.mubr.f32.mxu0 %v636_v48  ;;  %846 = vmatprep.mubr.f32.mxu1 %v1958_v0 }
 0x173   : > { %v650_v25 = vpop.permute.xlu1 %649  ;;  %v645_v32 = vpop.permute.xlu0 %644 }
 0x174   : > { %758 = vmatmul.mubr.f32.gmra.mxu0 %v635_v8  ;;  %1697 = vmatmul.mubr.msk.f32.gmra.mxu1 %vm662_vm10, %v637_v50 }
 0x175   : > { %1383 = vmatprep.mubr.f32.mxu0 %v1958_v0 }
 0x228   : > { %v741_v51 = vpop.f32.mrf.mxu0  ;;  %v830_v52 = vpop.f32.mrf.mxu1 }
 0x229   : > { %v742_v13 = vadd.f32 %v741_v51, %v645_v32 }
 0x22a   : > { %v743_v53 = vpop.f32.mrf.mxu0  ;;  %v832_v54 = vpop.f32.mrf.mxu1 }
 0x22b   : > { %v744_v62 = vadd.f32 %v743_v53, %v645_v32  ;;  %v831_v31 = vadd.f32 %v830_v52, %v742_v13 }
 0x22c   : > { %v747_v33 = vpop.f32.mrf.mxu0  ;;  %v836_v36 = vpop.f32.mrf.mxu1 }
 0x22d   : > { %v748_v27 = vadd.f32 %v747_v33, %v650_v25  ;;  %v833_v30 = vadd.f32 %v832_v54, %v744_v62 }
 0x22e   : > { %v749_v20 = vpop.f32.mrf.mxu0  ;;  %v838_v55 = vpop.f32.mrf.mxu1 }
 0x22f   : > { %v750_v57 = vadd.f32 %v749_v20, %v650_v25  ;;  %v837_v14 = vadd.f32 %v836_v36, %v748_v27  ;;  %v853_v34 = vadd.f32 %v833_v30, %v831_v31 }
 0x230   : > { %v753_v37 = vpop.f32.mrf.mxu0  ;;  %v842_v40 = vpop.f32.mrf.mxu1 }
 0x231   : > { %v754_v26 = vadd.f32 %v753_v37, %v655_v19  ;;  %v839_v11 = vadd.f32 %v838_v55, %v750_v57 }
 0x232   : > { %v755_v41 = vpop.f32.mrf.mxu0  ;;  %v844_v44 = vpop.f32.mrf.mxu1 }
 0x233   : > { %v756_v58 = vadd.f32 %v755_v41, %v655_v19  ;;  %v843_v28 = vadd.f32 %v842_v40, %v754_v26  ;;  %v856_v15 = vadd.f32 %v839_v11, %v837_v14 }
 0x234   : > { %v759_v45 = vpop.f32.mrf.mxu0  ;;  %v848_v46 = vpop.f32.mrf.mxu1 }
 0x235   : > { %v845_v59 = vadd.f32 %v844_v44, %v756_v58  ;;  %v760_v29 = vadd.f32 %v759_v45, %v660_v56 }
 0x236   : > { %v761_v60 = vpop.f32.mrf.mxu0  ;;  %v850_v12 = vpop.f32.mrf.mxu1 }
 0x237   : > { %v762_v63 = vadd.f32 %v761_v60, %v660_v56  ;;  %v859_v9 = vadd.f32 %v845_v59, %v843_v28  ;;  %v849_v22 = vadd.f32 %v848_v46, %v760_v29 }
 0x239   : > { %v851_v23 = vadd.f32 %v850_v12, %v762_v63  ;;  %860 = vadd.xlane.f32.xlu0 %v859_v9 }
 0x23b   : > { %v862_v18 = vadd.f32 %v851_v23, %v849_v22 }
 0x23d   : > { %857 = vadd.xlane.f32.xlu0 %v856_v15  ;;  %863 = vadd.xlane.f32.xlu1 %v862_v18 }
 0x241   : > { %854 = vadd.xlane.f32.xlu1 %v853_v34 }
 0x2c2   : > { %v861_v35 = vpop.xlane.xlu0 %860 }
 0x2c3   : > { %v868_v42 = vmul.f32 0.00390625, %v861_v35 }
 0x2c5   : > { %v874_v21 = vsub.f32 %v843_v28, %v868_v42  ;;  %v875_v3 = vsub.f32 %v845_v59, %v868_v42 }
 0x2c6   : > { %v864_v1 = vpop.xlane.xlu1 %863  ;;  %v858_v43 = vpop.xlane.xlu0 %857 }
 0x2c7   : > { %v869_v4 = vmul.f32 0.00390625, %v864_v1  ;;  %v867_v24 = vmul.f32 0.00390625, %v858_v43  ;;  %v882_v2 = vmul.f32 %v874_v21, %v874_v21  ;;  %v883_v5 = vmul.f32 %v875_v3, %v875_v3 }
 0x2c9   : > { %v876_v6 = vsub.f32 %v849_v22, %v869_v4  ;;  %v877_v7 = vsub.f32 %v851_v23, %v869_v4  ;;  %v872_v47 = vsub.f32 %v837_v14, %v867_v24  ;;  %v873_v48 = vsub.f32 %v839_v11, %v867_v24 }
 0x2ca   : > { %v855_v8 = vpop.xlane.xlu1 %854  ;;  %v892_v50 = vadd.f32 %v883_v5, %v882_v2 }
 0x2cb   : > { %v866_v51 = vmul.f32 0.00390625, %v855_v8  ;;  %v884_v52 = vmul.f32 %v876_v6, %v876_v6  ;;  %v885_v53 = vmul.f32 %v877_v7, %v877_v7  ;;  %v880_v54 = vmul.f32 %v872_v47, %v872_v47 }
 0x2cc   : > { %893 = vadd.xlane.f32.xlu1 %v892_v50  ;;  %v881_v20 = vmul.f32 %v873_v48, %v873_v48 }
 0x2cd   : > { %v870_v19 = vsub.f32 %v831_v31, %v866_v51  ;;  %v871_v33 = vsub.f32 %v833_v30, %v866_v51  ;;  %v895_v36 = vadd.f32 %v885_v53, %v884_v52 }
 0x2ce   : > { %v889_v40 = vadd.f32 %v881_v20, %v880_v54 }
 0x2cf   : > { %896 = vadd.xlane.f32.xlu0 %v895_v36  ;;  %v878_v55 = vmul.f32 %v870_v19, %v870_v19  ;;  %v879_v56 = vmul.f32 %v871_v33, %v871_v33 }
 0x2d1   : > { %v886_v37 = vadd.f32 %v879_v56, %v878_v55 }
 0x2d3   : > { %887 = vadd.xlane.f32.xlu1 %v886_v37  ;;  %890 = vadd.xlane.f32.xlu0 %v889_v40 }
 0x355   : > { %v894_v25 = vpop.xlane.xlu1 %893 }
 0x356   : > { %v900_v41 = vmul.f32 0.00390625, %v894_v25 }
 0x358   : > { %v897_v26 = vpop.xlane.xlu0 %896  ;;  %v904_v57 = vadd.f32 1e-05, %v900_v41 }
 0x359   : > { %v901_v45 = vmul.f32 0.00390625, %v897_v26 }
 0x35a   : > { %1792 = vrsqrt.f32 %v904_v57 }
 0x35b   : > { %v905_v28 = vadd.f32 1e-05, %v901_v45 }
 0x35c   : > { %v891_v44 = vpop.xlane.xlu0 %890  ;;  %v888_v46 = vpop.xlane.xlu1 %887 }
 0x35d   : > { %v899_v58 = vmul.f32 0.00390625, %v891_v44  ;;  %v898_v59 = vmul.f32 0.00390625, %v888_v46 }
 0x35f   : > { %v903_v27 = vadd.f32 1e-05, %v899_v58  ;;  %v902_v29 = vadd.f32 1e-05, %v898_v59 }
 0x361   : > { %1794 = vrsqrt.f32 %v903_v27 }
 0x362   : > { %1796 = vrsqrt.f32 %v905_v28 }
 0x363   : > { %1798 = vrsqrt.f32 %v902_v29 }
 0x367   : > { %v1793_v32 = vpop.eup %1792 }
 0x368   : > { %v915_v12 = vmul.f32 %v1793_v32, %v875_v3  ;;  %v914_v13 = vmul.f32 %v1793_v32, %v874_v21 }
 0x36a   : > { %v2534_v22 = vmax.f32 %v915_v12, 0.0  ;;  %v2536_v23 = vmax.f32 %v914_v13, 0.0 }
 0x36e   : > { %v1795_v60 = vpop.eup %1794 }
 0x36f   : > { %v913_v62 = vmul.f32 %v1795_v60, %v873_v48  ;;  %v912_v11 = vmul.f32 %v1795_v60, %v872_v47  ;;  %v1797_v14 = vpop.eup %1796 }
 0x370   : > { %v916_v30 = vmul.f32 %v1797_v14, %v876_v6  ;;  %v917_v15 = vmul.f32 %v1797_v14, %v877_v7  ;;  %v1799_v18 = vpop.eup %1798 }
 0x371   : > { %v2526_v63 = vmax.f32 %v913_v62, 0.0  ;;  %v2528_v9 = vmax.f32 %v912_v11, 0.0  ;;  %v911_v35 = vmul.f32 %v1799_v18, %v871_v33  ;;  %v910_v42 = vmul.f32 %v1799_v18, %v870_v19 }
 0x372   : > { %v2542_v31 = vmax.f32 %v916_v30, 0.0  ;;  %v2544_v34 = vmax.f32 %v917_v15, 0.0 }
 0x373   : > { %968 = vrot.lane.b32.xlu0 %v2526_v63, %s1959_s18  ;;  %960 = vrot.lane.b32.xlu1 %v2528_v9, %s1959_s18  ;;  %v2550_v21 = vmax.f32 %v911_v35, 0.0  ;;  %v2552_v3 = vmax.f32 %v910_v42, 0.0 }
 0x377   : > { %970 = vrot.lane.b32.xlu0 %v2534_v22, %s1959_s18  ;;  %962 = vrot.lane.b32.xlu1 %v2536_v23, %s1959_s18 }
 0x37b   : > { %964 = vrot.lane.b32.xlu0 %v2542_v31, %s1959_s18  ;;  %972 = vrot.lane.b32.xlu1 %v2544_v34, %s1959_s18 }
 0x37f   : > { %966 = vrot.lane.b32.xlu0 %v2550_v21, %s1959_s18  ;;  %958 = vrot.lane.b32.xlu1 %v2552_v3, %s1959_s18  ;;  %s1685_s18 = sshll.u32 %s299_s16, 6 }
 0x380   : > { %s301_s22 = scalar_lea.vmem [#allocation7], %s1685_s18 }
 0x381   : > { %s1593_s23 = sshll.u32 %s301_s22, 4  ;;  %s2974_s23 = int_to_ptr.vmem [resolvable:$true] %s1593_s23 }
 0x383   : > { %938 = vrot.lane.b32.xlu0 %v2534_v22, %s1960_s19  ;;  %930 = vrot.lane.b32.xlu1 %v2536_v23, %s1960_s19 }
 0x387   : > { %936 = vrot.lane.b32.xlu0 %v2526_v63, %s1960_s19  ;;  %928 = vrot.lane.b32.xlu1 %v2528_v9, %s1960_s19 }
 0x38b   : > { %940 = vrot.lane.b32.xlu0 %v2544_v34, %s1960_s19  ;;  %932 = vrot.lane.b32.xlu1 %v2542_v31, %s1960_s19 }
 0x38f   : > { %934 = vrot.lane.b32.xlu0 %v2550_v21, %s1960_s19  ;;  %926 = vrot.lane.b32.xlu1 %v2552_v3, %s1960_s19  ;;  %s1712_s19 = sshll.u32 %s2027_s28, 10 }
 0x390   : > { %s2970_s8 = scalar_lea.hbm %s3026_s7, %s1712_s19 }
 0x393   : > { %1026 = vrot.lane.b32.xlu0 %v2534_v22, %s1961_s20  ;;  %1002 = vrot.lane.b32.xlu1 %v2536_v23, %s1961_s20 }
 0x397   : > { %1024 = vrot.lane.b32.xlu0 %v2526_v63, %s1961_s20  ;;  %1000 = vrot.lane.b32.xlu1 %v2528_v9, %s1961_s20 }
 0x39b   : > { %1022 = vrot.lane.b32.xlu0 %v2550_v21, %s1961_s20  ;;  %998 = vrot.lane.b32.xlu1 %v2552_v3, %s1961_s20 }
 0x39f   : > { %1028 = vrot.lane.b32.xlu0 %v2544_v34, %s1961_s20  ;;  %1004 = vrot.lane.b32.xlu1 %v2542_v31, %s1961_s20 }
 0x3e5   : > { %v969_v1 = vpop.permute.xlu0 %968  ;;  %v961_v43 = vpop.permute.xlu1 %960 }
 0x3e6   : > { %v975_v51 = vsel %vm415_vm2, %v961_v43, %v969_v1  ;;  %v979_v52 = vsel %vm415_vm2, %v969_v1, %v961_v43  ;;  %v1197_v1 = vld [vmem:[%s3023_s4 + $0x18] sm:$0xff] }
 0x3e7   : > { %v2609_v19 = vmul.f32 %v2203_v17, %v975_v51  ;;  %v2612_v33 = vmul.f32 %v2200_v16, %v979_v52 }
 0x3e9   : > { %v971_v4 = vpop.permute.xlu0 %970  ;;  %v963_v24 = vpop.permute.xlu1 %962 }
 0x3ea   : > { %v976_v37 = vsel %vm415_vm2, %v963_v24, %v971_v4  ;;  %v980_v26 = vsel %vm415_vm2, %v971_v4, %v963_v24 }
 0x3eb   : > { %v2631_v57 = vmul.f32 %v2203_v17, %v976_v37  ;;  %v2638_v46 = vmul.f32 %v2200_v16, %v980_v26 }
 0x3ed   : > { %v965_v2 = vpop.permute.xlu0 %964  ;;  %v973_v5 = vpop.permute.xlu1 %972 }
 0x3ee   : > { %v977_v13 = vsel %vm415_vm2, %v965_v2, %v973_v5  ;;  %v981_v30 = vsel %vm415_vm2, %v973_v5, %v965_v2 }
 0x3ef   : > { %v2664_v18 = vmul.f32 %v2203_v17, %v977_v13  ;;  %v2668_v42 = vmul.f32 %v2200_v16, %v981_v30 }
 0x3f1   : > { %v967_v6 = vpop.permute.xlu0 %966  ;;  %v959_v7 = vpop.permute.xlu1 %958 }
 0x3f2   : > { %v974_v47 = vsel %vm415_vm2, %v959_v7, %v967_v6  ;;  %v978_v48 = vsel %vm415_vm2, %v967_v6, %v959_v7 }
 0x3f3   : > { %v2595_v8 = vmul.f32 %v2203_v17, %v974_v47  ;;  %v2598_v50 = vmul.f32 %v2200_v16, %v978_v48  ;;  %v1183_v16 = vld [vmem:[#allocation5 + $0x8] sm:$0xff]  ;;  %v1194_v17 = vld [vmem:[%s3023_s4] sm:$0xff] }
 0x3f4   : > { %1294 = vmatprep.mubr.f32.mxu1 %v1183_v16 }
 0x3f5   : > { %v939_v53 = vpop.permute.xlu0 %938  ;;  %1030 = vrot.lane.b32.xlu0 %v2598_v50, %s1961_s20  ;;  %1006 = vrot.lane.b32.xlu1 %v2595_v8, %s1961_s20  ;;  %v931_v54 = vpop.permute.xlu1 %930 }
 0x3f6   : > { %v944_v27 = vsel %vm382_vm5, %v931_v54, %v939_v53  ;;  %v948_v29 = vsel %vm382_vm5, %v939_v53, %v931_v54 }
 0x3f7   : > { %v955_v62 = vmul.f32 %v2249_v38, %v944_v27  ;;  %v954_v11 = vmul.f32 %v2252_v39, %v948_v29 }
 0x3f9   : > { %v937_v36 = vpop.permute.xlu0 %936  ;;  %1032 = vrot.lane.b32.xlu0 %v2612_v33, %s1961_s20  ;;  %1008 = vrot.lane.b32.xlu1 %v2609_v19, %s1961_s20  ;;  %v929_v20 = vpop.permute.xlu1 %928 }
 0x3fa   : > { %v943_v55 = vsel %vm382_vm5, %v929_v20, %v937_v36  ;;  %v947_v56 = vsel %vm382_vm5, %v937_v36, %v929_v20 }
 0x3fb   : > { %v952_v40 = vmul.f32 %v2252_v39, %v947_v56  ;;  %v953_v25 = vmul.f32 %v2249_v38, %v943_v55 }
 0x3fd   : > { %v941_v41 = vpop.permute.xlu0 %940  ;;  %992 = vrot.lane.b32.xlu1 %v952_v40, %s1961_s20  ;;  %1016 = vrot.lane.b32.xlu0 %v953_v25, %s1961_s20  ;;  %v933_v44 = vpop.permute.xlu1 %932 }
 0x3fe   : > { %v945_v58 = vsel %vm382_vm5, %v933_v44, %v941_v41  ;;  %v949_v45 = vsel %vm382_vm5, %v941_v41, %v933_v44 }
 0x3ff   : > { %v956_v28 = vmul.f32 %v2252_v39, %v949_v45  ;;  %v957_v59 = vmul.f32 %v2249_v38, %v945_v58 }
 0x401   : > { %v935_v32 = vpop.permute.xlu0 %934  ;;  %1010 = vrot.lane.b32.xlu1 %v2631_v57, %s1961_s20  ;;  %1034 = vrot.lane.b32.xlu0 %v2638_v46, %s1961_s20  ;;  %v927_v60 = vpop.permute.xlu1 %926 }
 0x402   : > { %1230 = vmatprep.subr.mxu1 %v957_v59  ;;  %v942_v12 = vsel %vm382_vm5, %v927_v60, %v935_v32  ;;  %v946_v14 = vsel %vm382_vm5, %v935_v32, %v927_v60 }
 0x403   : > { %1231 = vmatpush1.msra.mxu1 %v956_v28  ;;  %v951_v15 = vmul.f32 %v2249_v38, %v942_v12  ;;  %v950_v35 = vmul.f32 %v2252_v39, %v946_v14  ;;  %v1195_v38 = vld [vmem:[%s3023_s4 + $0x8] sm:$0xff]  ;;  %v1196_v39 = vld [vmem:[%s3023_s4 + $0x10] sm:$0xff] }
 0x404   : > { %1232 = vmatprep.subr.mxu1 %v955_v62 }
 0x405   : > { %1233 = vmatpush1.msra.mxu1 %v954_v11  ;;  %994 = vrot.lane.b32.xlu1 %v954_v11, %s1961_s20  ;;  %v1027_v43 = vpop.permute.xlu0 %1026  ;;  %v1003_v4 = vpop.permute.xlu1 %1002 }
 0x406   : > { %1018 = vrot.lane.b32.xlu0 %v955_v62, %s1961_s20  ;;  %1234 = vmatprep.subr.mxu1 %v953_v25 }
 0x407   : > { %1235 = vmatpush1.msra.mxu1 %v952_v40 }
 0x408   : > { %1236 = vmatprep.subr.mxu1 %v951_v15 }
 0x409   : > { %1237 = vmatpush1.msra.mxu1 %v950_v35  ;;  %1012 = vrot.lane.b32.xlu1 %v2664_v18, %s1961_s20  ;;  %v1025_v24 = vpop.permute.xlu0 %1024  ;;  %v1001_v2 = vpop.permute.xlu1 %1000 }
 0x40a   : > { %1036 = vrot.lane.b32.xlu0 %v2668_v42, %s1961_s20 }
 0x40d   : > { %990 = vrot.lane.b32.xlu1 %v950_v35, %s1961_s20  ;;  %v1023_v5 = vpop.permute.xlu0 %1022  ;;  %v999_v6 = vpop.permute.xlu1 %998 }
 0x40e   : > { %1014 = vrot.lane.b32.xlu0 %v951_v15, %s1961_s20 }
 0x411   : > { %1100 = vrot.lane.b32.xlu1 %v2542_v31, %s1962_s21  ;;  %v1029_v7 = vpop.permute.xlu0 %1028  ;;  %v1005_v47 = vpop.permute.xlu1 %1004 }
 0x412   : > { %1124 = vrot.lane.b32.xlu0 %v2544_v34, %s1962_s21  ;;  %v1045_v16 = vsel %vm480_vm7, %v1005_v47, %v1029_v7 }
 0x415   : > { %1098 = vrot.lane.b32.xlu1 %v2536_v23, %s1962_s21 }
 0x416   : > { %1122 = vrot.lane.b32.xlu0 %v2534_v22, %s1962_s21 }
 0x419   : > { %996 = vrot.lane.b32.xlu1 %v956_v28, %s1961_s20 }
 0x41a   : > { %1020 = vrot.lane.b32.xlu0 %v957_v59, %s1961_s20 }
 0x41d   : > { %1096 = vrot.lane.b32.xlu1 %v2528_v9, %s1962_s21 }
 0x41e   : > { %1120 = vrot.lane.b32.xlu0 %v2526_v63, %s1962_s21 }
 0x421   : > { %1094 = vrot.lane.b32.xlu1 %v2552_v3, %s1962_s21 }
 0x422   : > { %1118 = vrot.lane.b32.xlu0 %v2550_v21, %s1962_s21 }
 0x425   : > { %1090 = vrot.lane.b32.xlu1 %v954_v11, %s1962_s21  ;;  %v1057_v11 = vsel %vm480_vm7, %v1029_v7, %v1005_v47  ;;  %v1043_v7 = vsel %vm480_vm7, %v1001_v2, %v1025_v24 }
 0x426   : > { %1114 = vrot.lane.b32.xlu0 %v955_v62, %s1962_s21 }
 0x429   : > { %1092 = vrot.lane.b32.xlu1 %v956_v28, %s1962_s21 }
 0x42a   : > { %1116 = vrot.lane.b32.xlu0 %v957_v59, %s1962_s21 }
 0x42d   : > { %1088 = vrot.lane.b32.xlu1 %v952_v40, %s1962_s21 }
 0x42e   : > { %1112 = vrot.lane.b32.xlu0 %v953_v25, %s1962_s21 }
 0x431   : > { %1086 = vrot.lane.b32.xlu1 %v950_v35, %s1962_s21  ;;  %v1076_v35 = vmul.f32 %v2357_v49, %v1057_v11 }
 0x432   : > { %1110 = vrot.lane.b32.xlu0 %v951_v15, %s1962_s21  ;;  %v1056_v15 = vsel %vm480_vm7, %v1027_v43, %v1003_v4 }
 0x435   : > { %1106 = vrot.lane.b32.xlu1 %v2631_v57, %s1962_s21 }
 0x436   : > { %1130 = vrot.lane.b32.xlu0 %v2638_v46, %s1962_s21 }
 0x439   : > { %1108 = vrot.lane.b32.xlu1 %v2664_v18, %s1962_s21 }
 0x43a   : > { %1132 = vrot.lane.b32.xlu0 %v2668_v42, %s1962_s21 }
 0x43d   : > { %1104 = vrot.lane.b32.xlu1 %v2609_v19, %s1962_s21 }
 0x43e   : > { %1128 = vrot.lane.b32.xlu0 %v2612_v33, %s1962_s21 }
 0x441   : > { %1102 = vrot.lane.b32.xlu1 %v2595_v8, %s1962_s21 }
 0x442   : > { %1126 = vrot.lane.b32.xlu0 %v2598_v50, %s1962_s21  ;;  %s1884_s21 = scalar_lea.vmem %s2974_s23, 1024 }
 0x443   : > { %p1885_p10 = scmp.ne.s32.totalorder %s2974_s23, %s1884_s21 }
 0x445   : > { %1200 = vperm.xlu1 %1791, %v1194_v17   ;;  %v1055_v17 = vsel %vm480_vm7, %v1025_v24, %v1001_v2  ;;  %p1886_p12 = pnand %p1885_p10, %p2044_p5 }
 0x446   : > { %1205 = vperm.xlu0 %1790, %v1195_v38  }
 0x447   : > { %p1887_p8 = pneg %p1886_p12 }
 0x449   : > { %1210 = vperm.xlu1 %1791, %v1196_v39   ;;  %v1074_v39 = vmul.f32 %v2357_v49, %v1056_v15 }
 0x44a   : > { %1215 = vperm.xlu0 %1790, %v1197_v1  }
 0x467   : > { %v1031_v48 = vpop.permute.xlu0 %1030  ;;  %v1007_v51 = vpop.permute.xlu1 %1006 }
 0x468   : > { %v1058_v32 = vsel %vm480_vm7, %v1031_v48, %v1007_v51  ;;  %v1046_v30 = vsel %vm480_vm7, %v1007_v51, %v1031_v48  ;;  %v1044_v48 = vsel %vm480_vm7, %v1003_v4, %v1027_v43  ;;  %v1054_v51 = vsel %vm480_vm7, %v1023_v5, %v999_v6 }
 0x469   : > { %v1078_v13 = vmul.f32 %v2357_v49, %v1058_v32 }
 0x46b   : > { %v1033_v52 = vpop.permute.xlu0 %1032  ;;  %v1009_v53 = vpop.permute.xlu1 %1008 }
 0x46c   : > { %v1059_v45 = vsel %vm480_vm7, %v1033_v52, %v1009_v53  ;;  %v1047_v62 = vsel %vm480_vm7, %v1009_v53, %v1033_v52  ;;  %v1072_v52 = vmul.f32 %v2357_v49, %v1055_v17  ;;  %v1070_v53 = vmul.f32 %v2357_v49, %v1054_v51 }
 0x46d   : > { %v1080_v60 = vmul.f32 %v2357_v49, %v1059_v45 }
 0x46f   : > { %v2730_v54 = vpop.permute.xlu0 %1016  ;;  %v2732_v36 = vpop.permute.xlu1 %992 }
 0x470   : > { %v1039_v45 = vsel %vm480_vm7, %v2732_v36, %v2730_v54 }
 0x473   : > { %v1035_v20 = vpop.permute.xlu0 %1034  ;;  %v1011_v55 = vpop.permute.xlu1 %1010 }
 0x474   : > { %v1060_v26 = vsel %vm480_vm7, %v1035_v20, %v1011_v55  ;;  %v1048_v29 = vsel %vm480_vm7, %v1011_v55, %v1035_v20  ;;  %v1042_v55 = vsel %vm480_vm7, %v999_v6, %v1023_v5 }
 0x475   : > { %v1082_v28 = vmul.f32 %v2357_v49, %v1060_v26 }
 0x477   : > { %v2734_v56 = vpop.permute.xlu1 %994 }
 0x478   : > { %v1019_v37 = vpop.permute.xlu0 %1018 }
 0x479   : > { %v1052_v43 = vsel %vm480_vm7, %v1019_v37, %v2734_v56  ;;  %v1040_v26 = vsel %vm480_vm7, %v2734_v56, %v1019_v37 }
 0x47a   : > { %v1066_v6 = vmul.f32 %v2357_v49, %v1052_v43 }
 0x47b   : > { %v1013_v40 = vpop.permute.xlu1 %1012 }
 0x47c   : > { %v1037_v25 = vpop.permute.xlu0 %1036 }
 0x47d   : > { %v1061_v41 = vsel %vm480_vm7, %v1037_v25, %v1013_v40  ;;  %v1049_v44 = vsel %vm480_vm7, %v1013_v40, %v1037_v25  ;;  %v1051_v40 = vsel %vm480_vm7, %v2730_v54, %v2732_v36 }
 0x47e   : > { %v1084_v58 = vmul.f32 %v2357_v49, %v1061_v41  ;;  %1238 = vmatprep.subr.mxu1 %v1049_v44  ;;  %v1064_v44 = vmul.f32 %v2357_v49, %v1051_v40 }
 0x47f   : > { %v2745_v27 = vpop.permute.xlu1 %990 }
 0x480   : > { %v2748_v59 = vpop.permute.xlu0 %1014  ;;  %1239 = vmatpush1.msra.mxu1 %v1084_v58 }
 0x481   : > { %1240 = vmatprep.subr.mxu1 %v1048_v29  ;;  %v1050_v41 = vsel %vm480_vm7, %v2748_v59, %v2745_v27  ;;  %v1038_v32 = vsel %vm480_vm7, %v2745_v27, %v2748_v59 }
 0x482   : > { %1241 = vmatpush1.msra.mxu1 %v1082_v28  ;;  %v1062_v56 = vmul.f32 %v2357_v49, %v1050_v41 }
 0x483   : > { %1242 = vmatprep.subr.mxu1 %v1047_v62  ;;  %v1101_v12 = vpop.permute.xlu1 %1100 }
 0x484   : > { %v1125_v14 = vpop.permute.xlu0 %1124  ;;  %1243 = vmatpush1.msra.mxu1 %v1080_v60 }
 0x485   : > { %1244 = vmatprep.subr.mxu1 %v1046_v30  ;;  %v1153_v58 = vsel %vm577_vm8, %v1125_v14, %v1101_v12 }
 0x486   : > { %1245 = vmatpush1.msra.mxu1 %v1078_v13  ;;  %v1173_v60 = vmul.f32 %v2416_v61, %v1153_v58 }
 0x487   : > { %1246 = vmatprep.subr.mxu1 %v1045_v16  ;;  %v1099_v38 = vpop.permute.xlu1 %1098 }
 0x488   : > { %v1123_v1 = vpop.permute.xlu0 %1122  ;;  %1247 = vmatpush1.msra.mxu1 %v1076_v35 }
 0x489   : > { %1248 = vmatprep.subr.mxu1 %v1044_v48  ;;  %v1152_v37 = vsel %vm577_vm8, %v1123_v1, %v1099_v38  ;;  %v1140_v27 = vsel %vm577_vm8, %v1099_v38, %v1123_v1 }
 0x48a   : > { %1249 = vmatpush1.msra.mxu1 %v1074_v39  ;;  %v1171_v36 = vmul.f32 %v2416_v61, %v1152_v37  ;;  %v1193_v37 = vld [vmem:[#allocation5 + $0x58] sm:$0xff] }
 0x48b   : > { %1250 = vmatprep.subr.mxu1 %v1043_v7  ;;  %v997_v47 = vpop.permute.xlu1 %996 }
 0x48c   : > { %v1021_v20 = vpop.permute.xlu0 %1020  ;;  %1251 = vmatpush1.msra.mxu1 %v1072_v52 }
 0x48d   : > { %v1053_v4 = vsel %vm480_vm7, %v1021_v20, %v997_v47  ;;  %1252 = vmatprep.subr.mxu1 %v1042_v55  ;;  %v1041_v24 = vsel %vm480_vm7, %v997_v47, %v1021_v20 }
 0x48e   : > { %v1068_v2 = vmul.f32 %v2357_v49, %v1053_v4  ;;  %1253 = vmatpush1.msra.mxu1 %v1070_v53  ;;  %v1141_v49 = vsel %vm577_vm8, %v1101_v12, %v1125_v14 }
 0x48f   : > { %1254 = vmatprep.subr.mxu1 %v1041_v24  ;;  %v1097_v5 = vpop.permute.xlu1 %1096 }
 0x490   : > { %v1121_v25 = vpop.permute.xlu0 %1120  ;;  %1255 = vmatpush1.msra.mxu1 %v1068_v2 }
 0x491   : > { %1256 = vmatprep.subr.mxu1 %v1040_v26  ;;  %v1151_v54 = vsel %vm577_vm8, %v1121_v25, %v1097_v5  ;;  %v1139_v30 = vsel %vm577_vm8, %v1097_v5, %v1121_v25 }
 0x492   : > { %1257 = vmatpush1.msra.mxu1 %v1066_v6  ;;  %v1169_v59 = vmul.f32 %v2416_v61, %v1151_v54 }
 0x493   : > { %1258 = vmatprep.subr.mxu1 %v1039_v45  ;;  %v1095_v28 = vpop.permute.xlu1 %1094 }
 0x494   : > { %v1119_v29 = vpop.permute.xlu0 %1118  ;;  %1259 = vmatpush1.msra.mxu1 %v1064_v44 }
 0x495   : > { %1260 = vmatprep.subr.mxu1 %v1038_v32  ;;  %v1150_v11 = vsel %vm577_vm8, %v1119_v29, %v1095_v28  ;;  %v1138_v35 = vsel %vm577_vm8, %v1095_v28, %v1119_v29 }
 0x496   : > { %1261 = vmatpush1.msra.mxu1 %v1062_v56  ;;  %v1167_v12 = vmul.f32 %v2416_v61, %v1150_v11  ;;  %v1186_v56 = vld [vmem:[#allocation5 + $0x20] sm:$0xff] }
 0x497   : > { %1262 = vmatprep.subr.mxu1 %v1173_v60  ;;  %v1091_v62 = vpop.permute.xlu1 %1090 }
 0x498   : > { %v1115_v13 = vpop.permute.xlu0 %1114  ;;  %1263 = vmatpush2.msra.mxu1 %v1141_v49 }
 0x499   : > { %1264 = vmatprep.subr.mxu1 %v1171_v36  ;;  %v1148_v16 = vsel %vm577_vm8, %v1115_v13, %v1091_v62  ;;  %v1136_v7 = vsel %vm577_vm8, %v1091_v62, %v1115_v13 }
 0x49a   : > { %1265 = vmatpush2.msra.mxu1 %v1140_v27  ;;  %v1163_v1 = vmul.f32 %v2416_v61, %v1148_v16 }
 0x49b   : > { %1266 = vmatprep.subr.mxu1 %v1169_v59  ;;  %v1093_v14 = vpop.permute.xlu1 %1092 }
 0x49c   : > { %v1117_v15 = vpop.permute.xlu0 %1116  ;;  %1267 = vmatpush2.msra.mxu1 %v1139_v30 }
 0x49d   : > { %v1149_v17 = vsel %vm577_vm8, %v1117_v15, %v1093_v14  ;;  %1268 = vmatprep.subr.mxu1 %v1167_v12  ;;  %v1137_v48 = vsel %vm577_vm8, %v1093_v14, %v1117_v15 }
 0x49e   : > { %v1165_v38 = vmul.f32 %v2416_v61, %v1149_v17  ;;  %1269 = vmatpush2.msra.mxu1 %v1138_v35 }
 0x49f   : > { %v1089_v39 = vpop.permute.xlu1 %1088 }
 0x4a0   : > { %v1113_v51 = vpop.permute.xlu0 %1112  ;;  %1270 = vmatprep.subr.mxu1 %v1165_v38 }
 0x4a1   : > { %v1147_v52 = vsel %vm577_vm8, %v1113_v51, %v1089_v39  ;;  %1271 = vmatpush2.msra.mxu1 %v1137_v48  ;;  %v1135_v20 = vsel %vm577_vm8, %v1089_v39, %v1113_v51 }
 0x4a2   : > { %v1161_v47 = vmul.f32 %v2416_v61, %v1147_v52  ;;  %1272 = vmatprep.subr.mxu1 %v1163_v1 }
 0x4a3   : > { %1273 = vmatpush2.msra.mxu1 %v1136_v7  ;;  %v1087_v53 = vpop.permute.xlu1 %1086 }
 0x4a4   : > { %v1111_v55 = vpop.permute.xlu0 %1110  ;;  %1274 = vmatprep.subr.mxu1 %v1161_v47 }
 0x4a5   : > { %v1146_v43 = vsel %vm577_vm8, %v1111_v55, %v1087_v53  ;;  %1275 = vmatpush2.msra.mxu1 %v1135_v20  ;;  %v1134_v2 = vsel %vm577_vm8, %v1087_v53, %v1111_v55 }
 0x4a6   : > { %v1159_v4 = vmul.f32 %v2416_v61, %v1146_v43 }
 0x4a7   : > { %v1107_v24 = vpop.permute.xlu1 %1106 }
 0x4a8   : > { %v1131_v40 = vpop.permute.xlu0 %1130  ;;  %1276 = vmatprep.subr.mxu1 %v1159_v4 }
 0x4a9   : > { %1277 = vmatpush2.msra.mxu1 %v1134_v2  ;;  %v1156_v25 = vsel %vm577_vm8, %v1131_v40, %v1107_v24 }
 0x4aa   : > { %1278 = vmatprep.subr.mxu1 %v2668_v42 }
 0x4ab   : > { %1279 = vmatpush2.msra.mxu1 %v2664_v18  ;;  %v1109_v5 = vpop.permute.xlu1 %1108  ;;  %v1179_v18 = vmul.f32 %v2416_v61, %v1156_v25 }
 0x4ac   : > { %v1133_v6 = vpop.permute.xlu0 %1132  ;;  %1280 = vmatprep.subr.mxu1 %v2638_v46 }
 0x4ad   : > { %v1157_v26 = vsel %vm577_vm8, %v1133_v6, %v1109_v5  ;;  %1281 = vmatpush2.msra.mxu1 %v2631_v57  ;;  %v1145_v46 = vsel %vm577_vm8, %v1109_v5, %v1133_v6 }
 0x4ae   : > { %v1181_v41 = vmul.f32 %v2416_v61, %v1157_v26  ;;  %1282 = vmatprep.subr.mxu1 %v2612_v33  ;;  %v1144_v33 = vsel %vm577_vm8, %v1107_v24, %v1131_v40 }
 0x4af   : > { %1283 = vmatpush2.msra.mxu1 %v2609_v19  ;;  %v1105_v42 = vpop.permute.xlu1 %1104 }
 0x4b0   : > { %v1129_v44 = vpop.permute.xlu0 %1128  ;;  %1284 = vmatprep.subr.mxu1 %v2598_v50  ;;  %1343 = vmatprep.subr.mxu0 %v1181_v41 }
 0x4b1   : > { %v1155_v58 = vsel %vm577_vm8, %v1129_v44, %v1105_v42  ;;  %1285 = vmatpush2.msra.mxu1 %v2595_v8  ;;  %1344 = vmatpush1.msra.mxu0 %v1145_v46  ;;  %v1143_v50 = vsel %vm577_vm8, %v1105_v42, %v1129_v44 }
 0x4b2   : > { %v1177_v19 = vmul.f32 %v2416_v61, %v1155_v58  ;;  %1286 = vmatprep.subr.mxu1 %v2544_v34  ;;  %1345 = vmatprep.subr.mxu0 %v1179_v18 }
 0x4b3   : > { %1287 = vmatpush2.msra.mxu1 %v2542_v31  ;;  %1346 = vmatpush1.msra.mxu0 %v1144_v33  ;;  %v1103_v57 = vpop.permute.xlu1 %1102  ;;  %v1182_v31 = vld [vmem:[#allocation5] sm:$0xff] }
 0x4b4   : > { %v1127_v45 = vpop.permute.xlu0 %1126  ;;  %1288 = vmatprep.subr.mxu1 %v2534_v22  ;;  %1347 = vmatprep.subr.mxu0 %v1177_v19  ;;  %v1184_v22 = vld [vmem:[#allocation5 + $0x10] sm:$0xff] }
 0x4b5   : > { %v1154_v8 = vsel %vm577_vm8, %v1127_v45, %v1103_v57  ;;  %1289 = vmatpush2.msra.mxu1 %v2536_v23  ;;  %1348 = vmatpush1.msra.mxu0 %v1143_v50  ;;  %v1142_v28 = vsel %vm577_vm8, %v1103_v57, %v1127_v45  ;;  %v1190_v23 = vld [vmem:[#allocation5 + $0x40] sm:$0xff] }
 0x4b6   : > { %v1175_v34 = vmul.f32 %v2416_v61, %v1154_v8  ;;  %1290 = vmatprep.subr.mxu1 %v2526_v63  ;;  %v1185_v61 = vld [vmem:[#allocation5 + $0x18] sm:$0xff]  ;;  %v1187_v63 = vld [vmem:[#allocation5 + $0x28] sm:$0xff] }
 0x4b7   : > { %1291 = vmatpush2.msra.mxu1 %v2528_v9  ;;  %v1188_v9 = vld [vmem:[#allocation5 + $0x30] sm:$0xff] }
 0x4b8   : > { %1292 = vmatprep.subr.mxu1 %v2550_v21  ;;  %1349 = vmatprep.subr.mxu0 %v1175_v34  ;;  %v1192_v21 = vld [vmem:[#allocation5 + $0x50] sm:$0xff] }
 0x4b9   : > { %1293 = vmatpush2.msra.mxu1 %v2552_v3  ;;  %1350 = vmatpush1.msra.mxu0 %v1142_v28  ;;  %v1191_v3 = vld [vmem:[#allocation5 + $0x48] sm:$0xff] }
 0x4ba   : > { %1295 = vmatmul.mubr.f32.vlgmr.msra.gmra.mxu1 %v1182_v31  ;;  %1713 = vmatprep.subr.mxu1 %v1181_v41 }
 0x4bb   : > { %1717 = vmatpush1.msra.mxu1 %v1145_v46  ;;  %1698 = vmatmul.mubr.msk.f32.vlgmr.msra.gmra.mxu0 %vm662_vm10, %v1184_v22 }
 0x4bc   : > { %1714 = vmatprep.subr.mxu1 %v1179_v18  ;;  %1300 = vmatprep.mubr.f32.mxu1 %v1186_v56 }
 0x4bd   : > { %1718 = vmatpush1.msra.mxu1 %v1144_v33  ;;  %1389 = vmatprep.mubr.f32.mxu0 %v1958_v0 }
 0x4be   : > { %1301 = vmatmul.mubr.f32.gmra.mxu1 %v1185_v61  ;;  %1715 = vmatprep.subr.mxu1 %v1177_v19 }
 0x4bf   : > { %1719 = vmatpush1.msra.mxu1 %v1143_v50  ;;  %1699 = vmatmul.mubr.msk.f32.gmra.mxu0 %vm662_vm10, %v1187_v63 }
 0x4c0   : > { %1716 = vmatprep.subr.mxu1 %v1175_v34  ;;  %1306 = vmatprep.mubr.f32.mxu1 %v1189_v10  ;;  %v1201_v29 = vpop.permute.xlu1 %1200 }
 0x4c1   : > { %1720 = vmatpush1.msra.mxu1 %v1142_v28  ;;  %1395 = vmatprep.mubr.f32.mxu0 %v1958_v0  ;;  %v1206_v11 = vpop.permute.xlu0 %1205 }
 0x4c2   : > { %1307 = vmatmul.mubr.f32.gmra.mxu1 %v1188_v9 }
 0x4c3   : > { %1700 = vmatmul.mubr.msk.f32.gmra.mxu0 %vm662_vm10, %v1190_v23  ;;  %1312 = vmatprep.mubr.f32.mxu1 %v1192_v21 }
 0x4c4   : > { %v1211_v16 = vpop.permute.xlu1 %1210 }
 0x4c5   : > { %v1216_v24 = vpop.permute.xlu0 %1215 }
 0x4c6   : > { %1313 = vmatmul.mubr.f32.gmra.mxu1 %v1191_v3 }
 0x4c7   : > { %1401 = vmatprep.mubr.f32.mxu1 %v1958_v0 }
 0x4ca   : > { %1701 = vmatmul.mubr.msk.f32.vlgmr.msra.gmra.mxu1 %vm662_vm10, %v1193_v37 }
 0x57a   : > { %v1296_v32 = vpop.f32.mrf.mxu1 }
 0x57b   : > { %v1297_v60 = vadd.f32 %v1296_v32, %v1201_v29  ;;  %v1385_v54 = vpop.f32.mrf.mxu0 }
 0x57c   : > { %v1298_v49 = vpop.f32.mrf.mxu1 }
 0x57d   : > { %v1299_v36 = vadd.f32 %v1298_v49, %v1201_v29  ;;  %v1387_v62 = vpop.f32.mrf.mxu0  ;;  %v1386_v27 = vadd.f32 %v1385_v54, %v1297_v60 }
 0x57e   : > { %v1302_v13 = vpop.f32.mrf.mxu1 }
 0x57f   : > { %v1303_v59 = vadd.f32 %v1302_v13, %v1206_v11  ;;  %v1388_v30 = vadd.f32 %v1387_v62, %v1299_v36  ;;  %v1391_v12 = vpop.f32.mrf.mxu0 }
 0x580   : > { %v1304_v14 = vpop.f32.mrf.mxu1 }
 0x581   : > { %v1408_v15 = vadd.f32 %v1388_v30, %v1386_v27  ;;  %v1305_v35 = vadd.f32 %v1304_v14, %v1206_v11  ;;  %v1393_v0 = vpop.f32.mrf.mxu0  ;;  %v1392_v38 = vadd.f32 %v1391_v12, %v1303_v59 }
 0x582   : > { %v1308_v17 = vpop.f32.mrf.mxu1 }
 0x583   : > { %v1309_v39 = vadd.f32 %v1308_v17, %v1211_v16  ;;  %v1394_v1 = vadd.f32 %v1393_v0, %v1305_v35  ;;  %1409 = vadd.xlane.f32.xlu1 %v1408_v15  ;;  %v1397_v48 = vpop.f32.mrf.mxu0 }
 0x584   : > { %v1310_v51 = vpop.f32.mrf.mxu1 }
 0x585   : > { %v1411_v52 = vadd.f32 %v1394_v1, %v1392_v38  ;;  %v1311_v7 = vadd.f32 %v1310_v51, %v1211_v16  ;;  %v1399_v47 = vpop.f32.mrf.mxu0  ;;  %v1398_v20 = vadd.f32 %v1397_v48, %v1309_v39 }
 0x586   : > { %v1314_v53 = vpop.f32.mrf.mxu1 }
 0x587   : > { %v1400_v55 = vadd.f32 %v1399_v47, %v1311_v7  ;;  %1412 = vadd.xlane.f32.xlu0 %v1411_v52  ;;  %v1315_v40 = vadd.f32 %v1314_v53, %v1216_v24 }
 0x588   : > { %v1316_v43 = vpop.f32.mrf.mxu1 }
 0x589   : > { %v1414_v4 = vadd.f32 %v1400_v55, %v1398_v20  ;;  %v1317_v5 = vadd.f32 %v1316_v43, %v1216_v24 }
 0x58a   : > { %v1403_v2 = vpop.f32.mrf.mxu1 }
 0x58b   : > { %1415 = vadd.xlane.f32.xlu0 %v1414_v4  ;;  %v1404_v25 = vadd.f32 %v1403_v2, %v1315_v40 }
 0x58c   : > { %v1405_v6 = vpop.f32.mrf.mxu1 }
 0x58d   : > { %v1406_v26 = vadd.f32 %v1405_v6, %v1317_v5  ;;  %v1489_v5 = vld [vmem:[%s3024_s5 + $0x8] sm:$0xff] }
 0x58f   : > { %v1417_v41 = vadd.f32 %v1406_v26, %v1404_v25 }
 0x591   : > { %1418 = vadd.xlane.f32.xlu1 %v1417_v41 }
 0x60c   : > { %v1410_v42 = vpop.xlane.xlu1 %1409 }
 0x60d   : > { %v1420_v18 = vmul.f32 0.00390625, %v1410_v42 }
 0x60f   : > { %v1424_v46 = vsub.f32 %v1386_v27, %v1420_v18  ;;  %v1425_v44 = vsub.f32 %v1388_v30, %v1420_v18 }
 0x610   : > { %v1413_v58 = vpop.xlane.xlu0 %1412 }
 0x611   : > { %v1432_v33 = vmul.f32 %v1424_v46, %v1424_v46  ;;  %v1433_v19 = vmul.f32 %v1425_v44, %v1425_v44  ;;  %v1421_v57 = vmul.f32 0.00390625, %v1413_v58 }
 0x613   : > { %v1426_v50 = vsub.f32 %v1392_v38, %v1421_v57  ;;  %v1427_v45 = vsub.f32 %v1394_v1, %v1421_v57  ;;  %v1440_v8 = vadd.f32 %v1433_v19, %v1432_v33  ;;  %v1491_v33 = vld [vmem:[%s3024_s5 + $0x18] sm:$0xff] }
 0x614   : > { %v1416_v34 = vpop.xlane.xlu0 %1415 }
 0x615   : > { %v1434_v31 = vmul.f32 %v1426_v50, %v1426_v50  ;;  %v1435_v28 = vmul.f32 %v1427_v45, %v1427_v45  ;;  %v1422_v22 = vmul.f32 0.00390625, %v1416_v34  ;;  %1441 = vadd.xlane.f32.xlu0 %v1440_v8 }
 0x617   : > { %v1428_v56 = vsub.f32 %v1398_v20, %v1422_v22  ;;  %v1429_v61 = vsub.f32 %v1400_v55, %v1422_v22  ;;  %v1443_v63 = vadd.f32 %v1435_v28, %v1434_v31 }
 0x619   : > { %v1436_v10 = vmul.f32 %v1428_v56, %v1428_v56  ;;  %v1437_v9 = vmul.f32 %v1429_v61, %v1429_v61  ;;  %1444 = vadd.xlane.f32.xlu1 %v1443_v63 }
 0x61a   : > { %v1419_v23 = vpop.xlane.xlu1 %1418 }
 0x61b   : > { %v1423_v21 = vmul.f32 0.00390625, %v1419_v23  ;;  %v1446_v3 = vadd.f32 %v1437_v9, %v1436_v10 }
 0x61d   : > { %v1430_v37 = vsub.f32 %v1404_v25, %v1423_v21  ;;  %v1431_v29 = vsub.f32 %v1406_v26, %v1423_v21  ;;  %1447 = vadd.xlane.f32.xlu0 %v1446_v3  ;;  %v1488_v25 = vld [vmem:[%s3024_s5] sm:$0xff]  ;;  %v1490_v26 = vld [vmem:[%s3024_s5 + $0x10] sm:$0xff]  ;;  %v1512_v21 = vld [vmem:[%s3025_s6 + $0x8] sm:$0xff] }
 0x61e   : > { %v1511_v3 = vld [vmem:[%s3025_s6] sm:$0xff] }
 0x61f   : > { %v1438_v32 = vmul.f32 %v1430_v37, %v1430_v37  ;;  %v1439_v60 = vmul.f32 %v1431_v29, %v1431_v29 }
 0x621   : > { %v1449_v54 = vadd.f32 %v1439_v60, %v1438_v32  ;;  %v1513_v32 = vld [vmem:[%s3025_s6 + $0x10] sm:$0xff] }
 0x623   : > { %1450 = vadd.xlane.f32.xlu1 %v1449_v54 }
 0x69e   : > { %v1442_v49 = vpop.xlane.xlu0 %1441 }
 0x69f   : > { %v1452_v36 = vmul.f32 0.00390625, %v1442_v49 }
 0x6a1   : > { %v1456_v62 = vadd.f32 1e-05, %v1452_v36 }
 0x6a2   : > { %v1445_v11 = vpop.xlane.xlu1 %1444 }
 0x6a3   : > { %1800 = vrsqrt.f32 %v1456_v62  ;;  %v1453_v13 = vmul.f32 0.00390625, %v1445_v11 }
 0x6a5   : > { %v1457_v27 = vadd.f32 1e-05, %v1453_v13 }
 0x6a6   : > { %v1448_v59 = vpop.xlane.xlu0 %1447 }
 0x6a7   : > { %1802 = vrsqrt.f32 %v1457_v27  ;;  %v1454_v30 = vmul.f32 0.00390625, %v1448_v59 }
 0x6a9   : > { %v1458_v12 = vadd.f32 1e-05, %v1454_v30 }
 0x6ab   : > { %1804 = vrsqrt.f32 %v1458_v12 }
 0x6ac   : > { %v1451_v14 = vpop.xlane.xlu1 %1450 }
 0x6ad   : > { %v1455_v15 = vmul.f32 0.00390625, %v1451_v14 }
 0x6af   : > { %v1459_v35 = vadd.f32 1e-05, %v1455_v15 }
 0x6b0   : > { %v1801_v0 = vpop.eup %1800 }
 0x6b1   : > { %1806 = vrsqrt.f32 %v1459_v35  ;;  %v2893_v16 = vmul.f32 %v1801_v0, %v1424_v46  ;;  %v2895_v17 = vmul.f32 %v1801_v0, %v1425_v44 }
 0x6b3   : > { %v1472_v38 = vadd.f32 %v2895_v17, %v2893_v16 }
 0x6b4   : > { %v1803_v39 = vpop.eup %1802 }
 0x6b5   : > { %1473 = vadd.xlane.f32.xlu0 %v1472_v38  ;;  %v2899_v1 = vmul.f32 %v1803_v39, %v1426_v50  ;;  %v2901_v48 = vmul.f32 %v1803_v39, %v1427_v45 }
 0x6b7   : > { %v1475_v51 = vadd.f32 %v2901_v48, %v2899_v1 }
 0x6b8   : > { %v1805_v52 = vpop.eup %1804 }
 0x6b9   : > { %1476 = vadd.xlane.f32.xlu1 %v1475_v51  ;;  %v2905_v7 = vmul.f32 %v1805_v52, %v1428_v56  ;;  %v2907_v47 = vmul.f32 %v1805_v52, %v1429_v61 }
 0x6bb   : > { %v1478_v53 = vadd.f32 %v2907_v47, %v2905_v7 }
 0x6bd   : > { %1479 = vadd.xlane.f32.xlu0 %v1478_v53 }
 0x6be   : > { %v1807_v20 = vpop.eup %1806 }
 0x6bf   : > { %v2911_v55 = vmul.f32 %v1807_v20, %v1430_v37  ;;  %v2913_v43 = vmul.f32 %v1807_v20, %v1431_v29  ;;  %v1514_v29 = vld [vmem:[%s3025_s6 + $0x18] sm:$0xff] }
 0x6c1   : > { %v1481_v4 = vadd.f32 %v2913_v43, %v2911_v55 }
 0x6c3   : > { %1482 = vadd.xlane.f32.xlu1 %v1481_v4 }
 0x73e   : > { %v1474_v24 = vpop.xlane.xlu0 %1473 }
 0x73f   : > { %v1484_v6 = vmul.f32 0.00390625, %v1474_v24 }
 0x741   : > { %v1492_v46 = vmul.f32 %v1488_v25, %v1484_v6 }
 0x742   : > { %v1477_v2 = vpop.xlane.xlu1 %1476 }
 0x743   : > { %v1485_v40 = vmul.f32 0.00390625, %v1477_v2  ;;  %v1497_v57 = vsel %vm1496_vm11, %v1492_v46, 0.0  ;;  %v1825_v46 = vld [vmem:[%s2101_s17 + $0x18] sm:$0xff] }
 0x745   : > { %v1493_v42 = vmul.f32 %v1489_v5, %v1485_v40 }
 0x746   : > { %v1480_v41 = vpop.xlane.xlu0 %1479 }
 0x747   : > { %v1486_v18 = vmul.f32 0.00390625, %v1480_v41  ;;  %v1498_v58 = vsel %vm1496_vm11, %v1493_v42, 0.0  ;;  %v1824_v42 = vld [vmem:[%s2101_s17 + $0x10] sm:$0xff] }
 0x748   : > { %v1499_v8 = vadd.f32 %v1498_v58, %v1497_v57  ;;  %v1827_v57 = vld [vmem:[%s2101_s17 + $0x8] sm:$0xff] }
 0x749   : > { %v1494_v44 = vmul.f32 %v1490_v26, %v1486_v18 }
 0x74b   : > { %v1500_v50 = vsel %vm1496_vm11, %v1494_v44, 0.0 }
 0x74c   : > { %v1483_v19 = vpop.xlane.xlu1 %1482  ;;  %v1501_v31 = vadd.f32 %v1500_v50, %v1499_v8  ;;  %v1828_v8 = vld [vmem:[%s2101_s17 + $0x30] sm:$0xff] }
 0x74d   : > { %v1487_v45 = vmul.f32 0.00390625, %v1483_v19 }
 0x74f   : > { %v1495_v34 = vmul.f32 %v1491_v33, %v1487_v45  ;;  %v1826_v33 = vld [vmem:[%s2101_s17] sm:$0xff] }
 0x751   : > { %v1502_v28 = vsel %vm1496_vm11, %v1495_v34, 0.0 }
 0x752   : > { %v1503_v22 = vadd.f32 %v1502_v28, %v1501_v31  ;;  %v1829_v31 = vld [vmem:[%s2101_s17 + $0x38] sm:$0xff] }
 0x754   : > { %v1504_v56 = vrot.slane %v1503_v22, 4 }
 0x756   : > { %v1505_v61 = vadd.f32 %v1504_v56, %v1503_v22  ;;  %v1831_v22 = vld [vmem:[%s2101_s17 + $0x28] sm:$0xff] }
 0x758   : > { %v1506_v63 = vrot.slane %v1505_v61, 2 }
 0x75a   : > { %v1507_v10 = vadd.f32 %v1506_v63, %v1505_v61 }
 0x75c   : > { %v1508_v9 = vrot.slane %v1507_v10, 1 }
 0x75e   : > { %v1509_v23 = vadd.f32 %v1508_v9, %v1507_v10 }
 0x760   : > { %v1510_v37 = vmax.f32 %v1509_v23, 0.0 }
 0x762   : > { %v1516_v60 = vmul.f32 %v1512_v21, %v1510_v37  ;;  %v1515_v54 = vmul.f32 %v1511_v3, %v1510_v37  ;;  %v1518_v62 = vmul.f32 %v1514_v29, %v1510_v37  ;;  %v1517_v11 = vmul.f32 %v1513_v32, %v1510_v37 }
 0x764   : > { %v1522_v49 = vsel %vm1496_vm11, %v1516_v60, 0.0  ;;  %v1519_v36 = vsel %vm1496_vm11, %v1515_v54, 0.0  ;;  %v1528_v13 = vsel %vm1496_vm11, %v1518_v62, 0.0  ;;  %v1525_v27 = vsel %vm1496_vm11, %v1517_v11, 0.0 }
 0x765   : > { %1523 = vadd.xlane.f32.xlu1 %v1522_v49  ;;  %1520 = vadd.xlane.f32.xlu0 %v1519_v36 }
 0x769   : > { %1529 = vadd.xlane.f32.xlu1 %v1528_v13  ;;  %1526 = vadd.xlane.f32.xlu0 %v1525_v27 }
 0x7ee   : > { %v1524_v59 = vpop.xlane.xlu1 %1523  ;;  %v1521_v30 = vpop.xlane.xlu0 %1520 }
 0x7ef   : > { %v1703_v12 = vmul.f32 -1.442695, %v1524_v59  ;;  %v1702_v14 = vmul.f32 -1.442695, %v1521_v30 }
 0x7f1   : > { %1808 = vpow2.f32 %v1703_v12 }
 0x7f2   : > { %1810 = vpow2.f32 %v1702_v14  ;;  %v1530_v15 = vpop.xlane.xlu1 %1529  ;;  %v1527_v35 = vpop.xlane.xlu0 %1526 }
 0x7f3   : > { %v1705_v0 = vmul.f32 -1.442695, %v1530_v15  ;;  %v1704_v38 = vmul.f32 -1.442695, %v1527_v35 }
 0x7f5   : > { %1812 = vpow2.f32 %v1705_v0 }
 0x7f6   : > { %1814 = vpow2.f32 %v1704_v38 }
 0x7fe   : > { %v1809_v39 = vpop.eup %1808 }
 0x7ff   : > { %v1811_v51 = vpop.eup %1810  ;;  %v1544_v52 = vadd.f32 1.0, %v1809_v39 }
 0x800   : > { %v1543_v53 = vadd.f32 1.0, %v1811_v51 }
 0x801   : > { %1816 = vrcp.f32 %v1544_v52 }
 0x802   : > { %v1813_v20 = vpop.eup %1812  ;;  %1818 = vrcp.f32 %v1543_v53 }
 0x803   : > { %v1815_v4 = vpop.eup %1814  ;;  %v1546_v24 = vadd.f32 1.0, %v1813_v20 }
 0x804   : > { %v1545_v2 = vadd.f32 1.0, %v1815_v4 }
 0x805   : > { %1820 = vrcp.f32 %v1546_v24 }
 0x806   : > { %1822 = vrcp.f32 %v1545_v2 }
 0x80e   : > { %v1817_v40 = vpop.eup %1816 }
 0x80f   : > { %v1819_v5 = vpop.eup %1818  ;;  %v1557_v6 = vmul.f32 %v1817_v40, %v2899_v1  ;;  %v1558_v25 = vmul.f32 %v1817_v40, %v2901_v48 }
 0x810   : > { %v1555_v26 = vmul.f32 %v1819_v5, %v2893_v16  ;;  %v1556_v41 = vmul.f32 %v1819_v5, %v2895_v17 }
 0x811   : > { %v1565_v18 = vadd.f32 %v1824_v42, %v1557_v6  ;;  %v1566_v44 = vadd.f32 %v1825_v46, %v1558_v25 }
 0x812   : > { %v1821_v58 = vpop.eup %1820  ;;  %v1563_v19 = vadd.f32 %v1826_v33, %v1555_v26  ;;  %v1564_v50 = vadd.f32 %v1827_v57, %v1556_v41 }
 0x813   : > { %v1823_v45 = vpop.eup %1822  ;;  %1573 = vst [vmem:[%s301_s22 + $0x10] sm:$0xff] %v1565_v18  ;;  %1574 = vst [vmem:[%s301_s22 + $0x18] sm:$0xff] %v1566_v44  ;;  %v1561_v16 = vmul.f32 %v1821_v58, %v2911_v55  ;;  %v1562_v17 = vmul.f32 %v1821_v58, %v2913_v43  ;;  %v1830_v55 = vld [vmem:[%s2101_s17 + $0x20] sm:$0xff]  ;;  %s1888_s17 = sshll.u32 %s1964_s13, 4  ;;  %s1889_s17 = int_to_ptr.vmem [resolvable:$false] %s1888_s17 }
 0x814   : > { %1571 = vst [vmem:[%s301_s22] sm:$0xff] %v1563_v19  ;;  %1572 = vst [vmem:[%s301_s22 + $0x8] sm:$0xff] %v1564_v50  ;;  %v1559_v1 = vmul.f32 %v1823_v45, %v2905_v7  ;;  %v1560_v48 = vmul.f32 %v1823_v45, %v2907_v47  ;;  %s1890_s14 = scalar_lea.vmem %s1889_s17, 2048  ;;  %p1891_p11 = scmp.lt.s32.totalorder %s2974_s23, %s1889_s17 }
 0x815   : > { %v1569_v34 = vadd.f32 %v1828_v8, %v1561_v16  ;;  %v1570_v28 = vadd.f32 %v1829_v31, %v1562_v17  ;;  %p1892_p0 = scmp.lt.s32.totalorder %s1890_s14, %s1884_s21 }
 0x816   : > { %v1567_v43 = vadd.f32 %v1830_v55, %v1559_v1  ;;  %v1568_v56 = vadd.f32 %v1831_v22, %v1560_v48 }
 0x817   : > { %1577 = vst [vmem:[%s301_s22 + $0x30] sm:$0xff] %v1569_v34  ;;  %1578 = vst [vmem:[%s301_s22 + $0x38] sm:$0xff] %v1570_v28  ;;  %p1893_p1 = por %p1892_p0, %p1891_p11 }
 0x818   : > { %1575 = vst [vmem:[%s301_s22 + $0x20] sm:$0xff] %v1567_v43  ;;  %1576 = vst [vmem:[%s301_s22 + $0x28] sm:$0xff] %v1568_v56 }
 0x819   : > { %p1894_p3 = pnand %p1893_p1, %p1887_p8 }
 0x81b   : > { %1897 = shalt.err (!%p1894_p3)
}
 0x81c   : > { %s1898_s15 = scalar_lea.hbm %s2970_s8, 1024  ;;  %s1902_s19 = scalar_lea.hbm %s3026_s7, 2048 }
 0x81d   : > { %p1899_p2 = scmp.ne.s32.totalorder %s2970_s8, %s1898_s15  ;;  %p1903_p7 = scmp.lt.s32.totalorder %s2970_s8, %s3026_s7 }
 0x81e   : > { %p1904_p6 = scmp.lt.s32.totalorder %s1902_s19, %s1898_s15 }
 0x81f   : > { %p1900_p4 = pnand %p1899_p2, %p2044_p5 }
 0x820   : > { %p1905_p9 = por %p1904_p6, %p1903_p7 }
 0x821   : > { %p1901_p13 = pneg %p1900_p4 }
 0x823   : > { %p1906_p10 = pnand %p1905_p9, %p1901_p13 }
 0x825   : > { %1909 = shalt.err (!%p1906_p10)
}
 0x826   : > { %s1965_s29 = smov 256  }
 0x827   : > { %1729 = dma.vmem_to_hbm [thread:$0]  (%p2044_p5), %s2974_s23, 1024, %s2970_s8, %s2978_s9, %s1965_s29, %s1965_s29, %s1961_s20  }
 0x828 PF: > { %p1746_p12 = scmp.ge.s32.totalorder %s1952_s27, 2  ;;  %s1608_s21 = sand.u32 1, %s1940_s24  }
 0x829   : > { %p3036_p8 = scmp.ne.s32.totalorder %s3029_s12, 0  ;;  %s1609_s13 = scalar_lea.sflag [#allocation4], %s1608_s21 }
 0x82b   : > { %p1739_p11 = pnand %p1746_p12, %p3036_p8 }
 0x82d   : > { %p1740_p0 = pneg %p1739_p11 }
 0x82f   : > { %1935 = dma.done.wait (%p1740_p0), %s1609_s13, 1024  }
 0x830   : > { %1937 = vsyncadd (%p1740_p0), %s1609_s13, 4294966272  ;;  %p19_p1 = scmp.ge.s32.totalorder %s2031_s30, 4   ;;  %s3037_s24 = smov %s1944_s25 }
 0x831   : > { %s3038_s25 = smov %s1948_s26  ;;  %s3039_s26 = smov %s2042_s10 }
 0x832   : > { %s3040_s27 = smov %s2031_s30  ;;  %21 = sbr.rel (!%p19_p1) target bundleno = 5 (0x5), region = 92 }
 0x837   :  { %1614 = vsyncpa [#allocation3], 1 }
 0x838   :  { %1616 = vsyncpa [#allocation3 + $0x1], 1 }
 0x839   :  { %1617 = vsyncpa [#allocation6], 1 }
 0x83a   :  { %1618 = vsyncpa [#allocation4], 1 }
 0x83b   :  { %1620 = vsyncpa [#allocation4 + $0x1], 1 }

</bundles_post_ra>
